<compile_context>
chip_gen: v6e
topology: v6e:2x2x1
jax: 0.10.0
libtpu: 0.0.40
codegen_flags: <defaults>
</compile_context>

<pallas_src>
import math
from functools import partial

import jax
import jax.numpy as jnp
import numpy as np
from jax.experimental import pallas as pl
from jax.experimental.pallas import tpu as pltpu


def hetero_gat_kernel(ee_ref, feat_ref, el_ref, er_ref, code_ref,
                      out_ref, attn_ref, *,
                      num_heads, out_feats, num_etypes, neg_slope):
    """Per-dst-tile kernel.

    ee_ref   : (T, H)        SMEM, per-edge-type attention scalar table
    feat_ref : (Np, H*D)     bf16, projected features of ALL src nodes (resident)
    el_ref   : (H, Np)       f32, attn_l scores per src node (resident)
    er_ref   : (tile, H)     f32, attn_r scores for this dst tile
    code_ref : (tile, Np)    int8, 0 = no edge, t+1 = edge of type t
    out_ref  : (tile, H*D)   f32, aggregated output (flattened heads)
    attn_ref : (H, tile, Np) bf16, attention coefficients per edge
    """
    D = out_feats

    # Decode graph structure once per tile (shared across heads).
    code = code_ref[...].astype(jnp.float32)                    # (tile, Np)
    neg_mask = jnp.where(code > 0.5, 0.0, -1e30)                # additive mask
    type_masks = [(code == float(t + 1)).astype(jnp.float32)
                  for t in range(num_etypes)]

    outs = []
    for hd in range(num_heads):                                  # static, small
        # per-edge edge-type scalar: sum_t 1[etype==t] * ee[t, hd]
        ee_h = type_masks[0] * ee_ref[0, hd]
        for t in range(1, num_etypes):
            ee_h = ee_h + type_masks[t] * ee_ref[t, hd]

        # score[i_dst, j_src] = er[i] + el[j] + ee[etype(i,j)]
        s = er_ref[:, hd:hd + 1] + el_ref[hd:hd + 1, :] + ee_h   # (tile, Np)
        s = jnp.maximum(s, neg_slope * s)                        # leaky relu
        s = s + neg_mask                                         # mask non-edges

        # masked softmax over incoming edges (src axis = lanes)
        m = jnp.max(s, axis=-1, keepdims=True)
        p = jnp.exp(s - m)
        den = jnp.sum(p, axis=-1, keepdims=True)
        a = p * pl.reciprocal(den, approx=True)                  # EUP divide

        a16 = a.astype(jnp.bfloat16)
        attn_ref[hd] = a16

        # message passing: rst[i, hd, :] = sum_j a[i,j] * feat[j, hd, :]
        feat_h = feat_ref[:, hd * D:(hd + 1) * D]                # (Np, D) bf16
        outs.append(jnp.dot(a16, feat_h,
                            preferred_element_type=jnp.float32))  # (tile, D)

    # single lane-dense store of the whole (tile, H*D) slab
    out_ref[...] = jnp.concatenate(outs, axis=-1)


def _round_up(x, m):
    return ((x + m - 1) // m) * m


def _choose_tiling(n, num_heads, hd, budget_bytes=24 << 20):
    """Pick dst tile (multiple of 32) whose streamed, double-buffered blocks
    fit the VMEM budget; pad N up to a multiple of the tile."""
    n32 = _round_up(n, 32)
    tile = min(256, n32)

    def streamed(t):
        attn_b = num_heads * t * n32 * 2     # bf16 attn block
        code_b = t * n32                     # int8 edge codes
        out_b = t * hd * 4                   # f32 output block
        er_b = t * num_heads * 4             # f32 er block
        return 2 * (attn_b + code_b + out_b + er_b)   # double buffered

    while tile > 32 and streamed(tile) > budget_bytes:
        tile //= 2
    n_pad = _round_up(n, tile)
    return tile, n_pad


def simple_hetero_gat_forward(nfeat, adj, etype_id, params, *,
                              num_heads, out_feats, edge_feats,
                              negative_slope=0.2):
    """Glue: per-node projections + pallas_call over dst tiles.

    Returns (rst, attn) with rst: (N, H, D) f32 and attn: (H, N, N) bf16.
    """
    N, _ = nfeat.shape
    H, D = num_heads, out_feats
    HD = H * D
    T = params["edge_emb"].shape[0]

    # ---- O(N) per-node work (computed once, plain XLA) --------------------
    feat = nfeat @ params["fc_weight"].T                        # (N, HD) f32
    attn_l = params["attn_l"][0]                                # (H, D)
    attn_r = params["attn_r"][0]                                # (H, D)
    attn_e = params["attn_e"][0]                                # (H, Fe)
    feat_hd = feat.reshape(N, H, D)
    el = (feat_hd * attn_l[None]).sum(-1)                       # (N, H)
    er = (feat_hd * attn_r[None]).sum(-1)                       # (N, H)

    # per-edge-type scalar table: ee[t,h] = sum_f fc_e(edge_emb[t])[h,f]*attn_e[h,f]
    proj = (params["edge_emb"] @ params["fc_e_weight"].T).reshape(T, H, edge_feats)
    ee = (proj * attn_e[None]).sum(-1).astype(jnp.float32)      # (T, H)

    # ---- pack graph structure as int8: 0 = no edge, t+1 = edge type t -----
    edge_code = jnp.where(adj > 0, etype_id.astype(jnp.int32) + 1,
                          0).astype(jnp.int8)                   # (N, N)

    # ---- padding & tiling over destination nodes --------------------------
    tile, n_pad = _choose_tiling(N, H, HD)
    pad = n_pad - N
    feat_p = jnp.pad(feat, ((0, pad), (0, 0))).astype(jnp.bfloat16)   # (Np, HD)
    el_p = jnp.pad(el, ((0, pad), (0, 0))).T.astype(jnp.float32)      # (H, Np)
    er_p = jnp.pad(er, ((0, pad), (0, 0))).astype(jnp.float32)        # (Np, H)
    code_p = jnp.pad(edge_code, ((0, pad), (0, pad)))                 # (Np, Np)

    kernel = partial(hetero_gat_kernel, num_heads=H, out_feats=D,
                     num_etypes=T, neg_slope=negative_slope)

    flops = 2 * H * n_pad * n_pad * D + 10 * H * n_pad * n_pad
    bytes_accessed = (n_pad * n_pad                 # edge_code int8
                      + n_pad * HD * 2              # feat bf16
                      + 2 * H * n_pad * 4           # el + er f32
                      + T * H * 4                   # ee table
                      + n_pad * HD * 4              # out f32
                      + H * n_pad * n_pad * 2)      # attn bf16
    cost = pl.CostEstimate(flops=int(flops),
                           transcendentals=int(H * n_pad * n_pad),
                           bytes_accessed=int(bytes_accessed))

    out_p, attn_p = pl.pallas_call(
        kernel,
        out_shape=(jax.ShapeDtypeStruct((n_pad, HD), jnp.float32),
                   jax.ShapeDtypeStruct((H, n_pad, n_pad), jnp.bfloat16)),
        grid=(n_pad // tile,),
        in_specs=[
            pl.BlockSpec(memory_space=pltpu.MemorySpace.SMEM),      # ee table
            pl.BlockSpec((n_pad, HD), lambda i: (0, 0)),            # feat (resident)
            pl.BlockSpec((H, n_pad), lambda i: (0, 0)),             # el   (resident)
            pl.BlockSpec((tile, H), lambda i: (i, 0)),              # er tile
            pl.BlockSpec((tile, n_pad), lambda i: (i, 0)),          # edge_code tile
        ],
        out_specs=(
            pl.BlockSpec((tile, HD), lambda i: (i, 0)),             # out tile
            pl.BlockSpec((H, tile, n_pad), lambda i: (0, i, 0)),    # attn tile
        ),
        compiler_params=pltpu.CompilerParams(
            dimension_semantics=("parallel",),
            vmem_limit_bytes=64 * 1024 * 1024),
        cost_estimate=cost,
    )(ee, feat_p, el_p, er_p, code_p)

    rst = out_p[:N].reshape(N, H, D)
    attn = attn_p[:, :N, :N]
    return rst, attn


def ref_forward(nfeat, adj, etype_id, params, *, num_heads, out_feats,
                edge_feats, negative_slope=0.2):
    """Pure-JAX f32 reference mirroring the PyTorch/DGL semantics."""
    N = nfeat.shape[0]
    feat = (nfeat @ params["fc_weight"].T).reshape(N, num_heads, out_feats)
    el = (feat * params["attn_l"]).sum(-1)                       # (N, H)
    er = (feat * params["attn_r"]).sum(-1)                       # (N, H)
    proj = (params["edge_emb"] @ params["fc_e_weight"].T).reshape(
        -1, num_heads, edge_feats)
    ee = (proj * params["attn_e"]).sum(-1)                       # (T, H)
    ee_edge = ee[etype_id]                                       # (N, N, H)
    s = er[:, None, :] + el[None, :, :] + ee_edge                # (dst, src, H)
    s = jnp.where(s > 0, s, negative_slope * s)
    s = jnp.where(adj[:, :, None] > 0, s, -1e30)
    s = s - s.max(axis=1, keepdims=True)
    p = jnp.exp(s)
    a = p / p.sum(axis=1, keepdims=True) * adj[:, :, None]
    out = jnp.einsum('ijh,jhd->ihd', a, feat)
    return out, jnp.transpose(a, (2, 0, 1))


if __name__ == "__main__":
    # Small shapes consistent with the module: one node type,
    # in_feats = {"stock": 32}, out_feats=16, num_heads=4, edge_feats=8,
    # num_etypes=3, N=64 nodes.
    N, in_dim = 64, 32
    num_heads, out_feats = 4, 16
    edge_feats, num_etypes = 8, 3
    negative_slope = 0.2
    gain = math.sqrt(2.0)  # calculate_gain('relu')

    key = jax.random.PRNGKey(0)
    keys = jax.random.split(key, 9)

    def xavier(k, shape, fan_in, fan_out):
        std = gain * math.sqrt(2.0 / (fan_in + fan_out))
        return (std * jax.random.normal(k, shape)).astype(jnp.float32)

    params = {
        "fc_weight": xavier(keys[0], (num_heads * out_feats, in_dim),
                            in_dim, num_heads * out_feats),
        "fc_e_weight": xavier(keys[1], (edge_feats * num_heads, edge_feats),
                              edge_feats, edge_feats * num_heads),
        "attn_l": xavier(keys[2], (1, num_heads, out_feats),
                         out_feats, num_heads * out_feats),
        "attn_r": xavier(keys[3], (1, num_heads, out_feats),
                         out_feats, num_heads * out_feats),
        "attn_e": xavier(keys[4], (1, num_heads, edge_feats),
                         edge_feats, num_heads * edge_feats),
        "edge_emb": jax.random.normal(keys[5], (num_etypes, edge_feats),
                                      dtype=jnp.float32),
    }

    nfeat = jax.random.normal(keys[6], (N, in_dim), dtype=jnp.float32)
    adj = (jax.random.uniform(keys[7], (N, N)) < 0.2).astype(jnp.float32)
    adj = jnp.maximum(adj, jnp.eye(N, dtype=jnp.float32))  # self loops
    etype_id = jax.random.randint(keys[8], (N, N), 0, num_etypes)

    rst, attn = simple_hetero_gat_forward(
        nfeat, adj, etype_id, params,
        num_heads=num_heads, out_feats=out_feats, edge_feats=edge_feats,
        negative_slope=negative_slope)
    rst = jax.block_until_ready(rst)
    attn = jax.block_until_ready(attn)

    rst_ref, attn_ref = ref_forward(
        nfeat, adj, etype_id, params,
        num_heads=num_heads, out_feats=out_feats, edge_feats=edge_feats,
        negative_slope=negative_slope)

    # bf16 attention coefficients + bf16 MXU aggregation -> ~2^-8 relative
    # rounding; compare at 1e-2 against the full-f32 reference.
    np.testing.assert_allclose(np.asarray(rst), np.asarray(rst_ref),
                               rtol=1e-2, atol=1e-2)
    np.testing.assert_allclose(np.asarray(attn.astype(jnp.float32)),
                               np.asarray(attn_ref), rtol=1e-2, atol=1e-2)
    print("KERNEL_OK")
</pallas_src>

<mosaic_0001>
module attributes {stable_mosaic.version = 11 : i64} {
  func.func @hetero_gat_kernel(%arg0: i32, %arg1: memref<3x4xf32, #tpu.memory_space<smem>>, %arg2: memref<64x64xbf16, #tpu.memory_space<vmem>>, %arg3: memref<4x64xf32, #tpu.memory_space<vmem>>, %arg4: memref<64x4xf32, #tpu.memory_space<vmem>>, %arg5: memref<64x64xi8, #tpu.memory_space<vmem>>, %arg6: memref<64x64xf32, #tpu.memory_space<vmem>>, %arg7: memref<4x64x64xbf16, #tpu.memory_space<vmem>>) attributes {dimension_semantics = [#tpu.dimension_semantics<parallel>], iteration_bounds = array<i64: 1>, scalar_prefetch = 0 : i64, scratch_operands = 0 : i64, tpu.core_type = #tpu.core_type<tc>, window_params = [{transform_indices = @transform_0, window_bounds = array<i64: 3, 4>}, {pipeline_mode = #tpu.pipeline_mode<synchronous>, transform_indices = @transform_1, window_bounds = array<i64: 64, 64>}, {pipeline_mode = #tpu.pipeline_mode<synchronous>, transform_indices = @transform_2, window_bounds = array<i64: 4, 64>}, {transform_indices = @transform_3, window_bounds = array<i64: 64, 4>}, {transform_indices = @transform_4, window_bounds = array<i64: 64, 64>}, {transform_indices = @transform_5, window_bounds = array<i64: 64, 64>}, {transform_indices = @transform_6, window_bounds = array<i64: 4, 64, 64>}]} {
    %c0 = arith.constant 0 : index
    %c0_0 = arith.constant 0 : index
    %0 = vector.load %arg5[%c0, %c0_0] : memref<64x64xi8, #tpu.memory_space<vmem>>, vector<64x64xi8>
    %1 = arith.sitofp %0 : vector<64x64xi8> to vector<64x64xf32>
    %cst = arith.constant 5.000000e-01 : f32
    %2 = vector.broadcast %cst : f32 to vector<64x64xf32>
    %3 = arith.cmpf ogt, %1, %2 : vector<64x64xf32>
    %cst_1 = arith.constant 0.000000e+00 : f32
    %cst_2 = arith.constant -1.000000e+30 : f32
    %4 = vector.broadcast %cst_1 : f32 to vector<64x64xf32>
    %5 = vector.broadcast %cst_2 : f32 to vector<64x64xf32>
    %6 = arith.select %3, %4, %5 : vector<64x64xi1>, vector<64x64xf32>
    %cst_3 = arith.constant 1.000000e+00 : f32
    %7 = vector.broadcast %cst_3 : f32 to vector<64x64xf32>
    %8 = arith.cmpf oeq, %1, %7 : vector<64x64xf32>
    %9 = arith.extui %8 : vector<64x64xi1> to vector<64x64xi32>
    %10 = arith.sitofp %9 : vector<64x64xi32> to vector<64x64xf32>
    %cst_4 = arith.constant 2.000000e+00 : f32
    %11 = vector.broadcast %cst_4 : f32 to vector<64x64xf32>
    %12 = arith.cmpf oeq, %1, %11 : vector<64x64xf32>
    %13 = arith.extui %12 : vector<64x64xi1> to vector<64x64xi32>
    %14 = arith.sitofp %13 : vector<64x64xi32> to vector<64x64xf32>
    %cst_5 = arith.constant 3.000000e+00 : f32
    %15 = vector.broadcast %cst_5 : f32 to vector<64x64xf32>
    %16 = arith.cmpf oeq, %1, %15 : vector<64x64xf32>
    %17 = arith.extui %16 : vector<64x64xi1> to vector<64x64xi32>
    %18 = arith.sitofp %17 : vector<64x64xi32> to vector<64x64xf32>
    %c0_6 = arith.constant 0 : index
    %c0_7 = arith.constant 0 : index
    %19 = memref.load %arg1[%c0_6, %c0_7] : memref<3x4xf32, #tpu.memory_space<smem>>
    %20 = vector.broadcast %19 : f32 to vector<64x64xf32>
    %21 = arith.mulf %10, %20 : vector<64x64xf32>
    %c1 = arith.constant 1 : index
    %c0_8 = arith.constant 0 : index
    %22 = memref.load %arg1[%c1, %c0_8] : memref<3x4xf32, #tpu.memory_space<smem>>
    %23 = vector.broadcast %22 : f32 to vector<64x64xf32>
    %24 = arith.mulf %14, %23 : vector<64x64xf32>
    %25 = arith.addf %21, %24 : vector<64x64xf32>
    %c2 = arith.constant 2 : index
    %c0_9 = arith.constant 0 : index
    %26 = memref.load %arg1[%c2, %c0_9] : memref<3x4xf32, #tpu.memory_space<smem>>
    %27 = vector.broadcast %26 : f32 to vector<64x64xf32>
    %28 = arith.mulf %18, %27 : vector<64x64xf32>
    %29 = arith.addf %25, %28 : vector<64x64xf32>
    %c0_10 = arith.constant 0 : index
    %c0_11 = arith.constant 0 : index
    %30 = vector.load %arg4[%c0_10, %c0_11] : memref<64x4xf32, #tpu.memory_space<vmem>>, vector<64x1xf32>
    %c0_12 = arith.constant 0 : index
    %c0_13 = arith.constant 0 : index
    %31 = vector.load %arg3[%c0_12, %c0_13] : memref<4x64xf32, #tpu.memory_space<vmem>>, vector<1x64xf32>
    %32 = vector.broadcast %30 : vector<64x1xf32> to vector<64x64xf32>
    %33 = vector.broadcast %31 : vector<1x64xf32> to vector<64x64xf32>
    %34 = arith.addf %32, %33 : vector<64x64xf32>
    %35 = arith.addf %34, %29 : vector<64x64xf32>
    %cst_14 = arith.constant 2.000000e-01 : f32
    %36 = vector.broadcast %cst_14 : f32 to vector<64x64xf32>
    %37 = arith.mulf %36, %35 : vector<64x64xf32>
    %38 = arith.maximumf %35, %37 : vector<64x64xf32>
    %39 = arith.addf %38, %6 : vector<64x64xf32>
    %cst_15 = arith.constant dense<0xFF800000> : vector<64xf32>
    %40 = vector.multi_reduction <maximumf>, %39, %cst_15 [1] : vector<64x64xf32> to vector<64xf32>
    %41 = vector.shape_cast %40 : vector<64xf32> to vector<64x1xf32>
    %42 = vector.broadcast %41 : vector<64x1xf32> to vector<64x64xf32>
    %43 = arith.subf %39, %42 : vector<64x64xf32>
    %44 = math.exp %43 : vector<64x64xf32>
    %cst_16 = arith.constant dense<0.000000e+00> : vector<64xf32>
    %45 = vector.multi_reduction <add>, %44, %cst_16 [1] : vector<64x64xf32> to vector<64xf32>
    %46 = vector.shape_cast %45 : vector<64xf32> to vector<64x1xf32>
    %47 = tpu.reciprocal %46 {approx = true} : vector<64x1xf32> -> vector<64x1xf32>
    %48 = vector.broadcast %47 : vector<64x1xf32> to vector<64x64xf32>
    %49 = arith.mulf %44, %48 : vector<64x64xf32>
    %50 = arith.truncf %49 : vector<64x64xf32> to vector<64x64xbf16>
    %c0_17 = arith.constant 0 : index
    %c0_18 = arith.constant 0 : index
    %c0_19 = arith.constant 0 : index
    %51 = vector.load %arg7[%c0_17, %c0_18, %c0_19] : memref<4x64x64xbf16, #tpu.memory_space<vmem>>, vector<1x64x64xbf16>
    %52 = vector.shape_cast %51 : vector<1x64x64xbf16> to vector<64x64xbf16>
    %53 = vector.shape_cast %50 : vector<64x64xbf16> to vector<1x64x64xbf16>
    tpu.vector_store %arg7[%c0_17, %c0_18, %c0_19], %53 {strides = array<i32>} : memref<4x64x64xbf16, #tpu.memory_space<vmem>>, vector<1x64x64xbf16>,
    %c0_20 = arith.constant 0 : index
    %c0_21 = arith.constant 0 : index
    %54 = vector.load %arg2[%c0_20, %c0_21] : memref<64x64xbf16, #tpu.memory_space<vmem>>, vector<64x16xbf16>
    %cst_22 = arith.constant dense<0.000000e+00> : vector<64x16xf32>
    %55 = tpu.matmul %50, %54, %cst_22 {dimension_numbers = #tpu.dot_dimension_numbers<[1], [0], [0], [1], [0, 0, 1, 1], [], []>} : vector<64x64xbf16>, vector<64x16xbf16>, vector<64x16xf32> -> vector<64x16xf32>
    %c0_23 = arith.constant 0 : index
    %c1_24 = arith.constant 1 : index
    %56 = memref.load %arg1[%c0_23, %c1_24] : memref<3x4xf32, #tpu.memory_space<smem>>
    %57 = vector.broadcast %56 : f32 to vector<64x64xf32>
    %58 = arith.mulf %10, %57 : vector<64x64xf32>
    %c1_25 = arith.constant 1 : index
    %c1_26 = arith.constant 1 : index
    %59 = memref.load %arg1[%c1_25, %c1_26] : memref<3x4xf32, #tpu.memory_space<smem>>
    %60 = vector.broadcast %59 : f32 to vector<64x64xf32>
    %61 = arith.mulf %14, %60 : vector<64x64xf32>
    %62 = arith.addf %58, %61 : vector<64x64xf32>
    %c2_27 = arith.constant 2 : index
    %c1_28 = arith.constant 1 : index
    %63 = memref.load %arg1[%c2_27, %c1_28] : memref<3x4xf32, #tpu.memory_space<smem>>
    %64 = vector.broadcast %63 : f32 to vector<64x64xf32>
    %65 = arith.mulf %18, %64 : vector<64x64xf32>
    %66 = arith.addf %62, %65 : vector<64x64xf32>
    %c0_29 = arith.constant 0 : index
    %c1_30 = arith.constant 1 : index
    %67 = vector.load %arg4[%c0_29, %c1_30] : memref<64x4xf32, #tpu.memory_space<vmem>>, vector<64x1xf32>
    %c1_31 = arith.constant 1 : index
    %c0_32 = arith.constant 0 : index
    %68 = vector.load %arg3[%c1_31, %c0_32] : memref<4x64xf32, #tpu.memory_space<vmem>>, vector<1x64xf32>
    %69 = vector.broadcast %67 : vector<64x1xf32> to vector<64x64xf32>
    %70 = vector.broadcast %68 : vector<1x64xf32> to vector<64x64xf32>
    %71 = arith.addf %69, %70 : vector<64x64xf32>
    %72 = arith.addf %71, %66 : vector<64x64xf32>
    %cst_33 = arith.constant 2.000000e-01 : f32
    %73 = vector.broadcast %cst_33 : f32 to vector<64x64xf32>
    %74 = arith.mulf %73, %72 : vector<64x64xf32>
    %75 = arith.maximumf %72, %74 : vector<64x64xf32>
    %76 = arith.addf %75, %6 : vector<64x64xf32>
    %cst_34 = arith.constant dense<0xFF800000> : vector<64xf32>
    %77 = vector.multi_reduction <maximumf>, %76, %cst_34 [1] : vector<64x64xf32> to vector<64xf32>
    %78 = vector.shape_cast %77 : vector<64xf32> to vector<64x1xf32>
    %79 = vector.broadcast %78 : vector<64x1xf32> to vector<64x64xf32>
    %80 = arith.subf %76, %79 : vector<64x64xf32>
    %81 = math.exp %80 : vector<64x64xf32>
    %cst_35 = arith.constant dense<0.000000e+00> : vector<64xf32>
    %82 = vector.multi_reduction <add>, %81, %cst_35 [1] : vector<64x64xf32> to vector<64xf32>
    %83 = vector.shape_cast %82 : vector<64xf32> to vector<64x1xf32>
    %84 = tpu.reciprocal %83 {approx = true} : vector<64x1xf32> -> vector<64x1xf32>
    %85 = vector.broadcast %84 : vector<64x1xf32> to vector<64x64xf32>
    %86 = arith.mulf %81, %85 : vector<64x64xf32>
    %87 = arith.truncf %86 : vector<64x64xf32> to vector<64x64xbf16>
    %c1_36 = arith.constant 1 : index
    %c0_37 = arith.constant 0 : index
    %c0_38 = arith.constant 0 : index
    %88 = vector.load %arg7[%c1_36, %c0_37, %c0_38] : memref<4x64x64xbf16, #tpu.memory_space<vmem>>, vector<1x64x64xbf16>
    %89 = vector.shape_cast %88 : vector<1x64x64xbf16> to vector<64x64xbf16>
    %90 = vector.shape_cast %87 : vector<64x64xbf16> to vector<1x64x64xbf16>
    tpu.vector_store %arg7[%c1_36, %c0_37, %c0_38], %90 {strides = array<i32>} : memref<4x64x64xbf16, #tpu.memory_space<vmem>>, vector<1x64x64xbf16>,
    %c0_39 = arith.constant 0 : index
    %c16 = arith.constant 16 : index
    %91 = vector.load %arg2[%c0_39, %c16] : memref<64x64xbf16, #tpu.memory_space<vmem>>, vector<64x16xbf16>
    %cst_40 = arith.constant dense<0.000000e+00> : vector<64x16xf32>
    %92 = tpu.matmul %87, %91, %cst_40 {dimension_numbers = #tpu.dot_dimension_numbers<[1], [0], [0], [1], [0, 0, 1, 1], [], []>} : vector<64x64xbf16>, vector<64x16xbf16>, vector<64x16xf32> -> vector<64x16xf32>
    %c0_41 = arith.constant 0 : index
    %c2_42 = arith.constant 2 : index
    %93 = memref.load %arg1[%c0_41, %c2_42] : memref<3x4xf32, #tpu.memory_space<smem>>
    %94 = vector.broadcast %93 : f32 to vector<64x64xf32>
    %95 = arith.mulf %10, %94 : vector<64x64xf32>
    %c1_43 = arith.constant 1 : index
    %c2_44 = arith.constant 2 : index
    %96 = memref.load %arg1[%c1_43, %c2_44] : memref<3x4xf32, #tpu.memory_space<smem>>
    %97 = vector.broadcast %96 : f32 to vector<64x64xf32>
    %98 = arith.mulf %14, %97 : vector<64x64xf32>
    %99 = arith.addf %95, %98 : vector<64x64xf32>
    %c2_45 = arith.constant 2 : index
    %c2_46 = arith.constant 2 : index
    %100 = memref.load %arg1[%c2_45, %c2_46] : memref<3x4xf32, #tpu.memory_space<smem>>
    %101 = vector.broadcast %100 : f32 to vector<64x64xf32>
    %102 = arith.mulf %18, %101 : vector<64x64xf32>
    %103 = arith.addf %99, %102 : vector<64x64xf32>
    %c0_47 = arith.constant 0 : index
    %c2_48 = arith.constant 2 : index
    %104 = vector.load %arg4[%c0_47, %c2_48] : memref<64x4xf32, #tpu.memory_space<vmem>>, vector<64x1xf32>
    %c2_49 = arith.constant 2 : index
    %c0_50 = arith.constant 0 : index
    %105 = vector.load %arg3[%c2_49, %c0_50] : memref<4x64xf32, #tpu.memory_space<vmem>>, vector<1x64xf32>
    %106 = vector.broadcast %104 : vector<64x1xf32> to vector<64x64xf32>
    %107 = vector.broadcast %105 : vector<1x64xf32> to vector<64x64xf32>
    %108 = arith.addf %106, %107 : vector<64x64xf32>
    %109 = arith.addf %108, %103 : vector<64x64xf32>
    %cst_51 = arith.constant 2.000000e-01 : f32
    %110 = vector.broadcast %cst_51 : f32 to vector<64x64xf32>
    %111 = arith.mulf %110, %109 : vector<64x64xf32>
    %112 = arith.maximumf %109, %111 : vector<64x64xf32>
    %113 = arith.addf %112, %6 : vector<64x64xf32>
    %cst_52 = arith.constant dense<0xFF800000> : vector<64xf32>
    %114 = vector.multi_reduction <maximumf>, %113, %cst_52 [1] : vector<64x64xf32> to vector<64xf32>
    %115 = vector.shape_cast %114 : vector<64xf32> to vector<64x1xf32>
    %116 = vector.broadcast %115 : vector<64x1xf32> to vector<64x64xf32>
    %117 = arith.subf %113, %116 : vector<64x64xf32>
    %118 = math.exp %117 : vector<64x64xf32>
    %cst_53 = arith.constant dense<0.000000e+00> : vector<64xf32>
    %119 = vector.multi_reduction <add>, %118, %cst_53 [1] : vector<64x64xf32> to vector<64xf32>
    %120 = vector.shape_cast %119 : vector<64xf32> to vector<64x1xf32>
    %121 = tpu.reciprocal %120 {approx = true} : vector<64x1xf32> -> vector<64x1xf32>
    %122 = vector.broadcast %121 : vector<64x1xf32> to vector<64x64xf32>
    %123 = arith.mulf %118, %122 : vector<64x64xf32>
    %124 = arith.truncf %123 : vector<64x64xf32> to vector<64x64xbf16>
    %c2_54 = arith.constant 2 : index
    %c0_55 = arith.constant 0 : index
    %c0_56 = arith.constant 0 : index
    %125 = vector.load %arg7[%c2_54, %c0_55, %c0_56] : memref<4x64x64xbf16, #tpu.memory_space<vmem>>, vector<1x64x64xbf16>
    %126 = vector.shape_cast %125 : vector<1x64x64xbf16> to vector<64x64xbf16>
    %127 = vector.shape_cast %124 : vector<64x64xbf16> to vector<1x64x64xbf16>
    tpu.vector_store %arg7[%c2_54, %c0_55, %c0_56], %127 {strides = array<i32>} : memref<4x64x64xbf16, #tpu.memory_space<vmem>>, vector<1x64x64xbf16>,
    %c0_57 = arith.constant 0 : index
    %c32 = arith.constant 32 : index
    %128 = vector.load %arg2[%c0_57, %c32] : memref<64x64xbf16, #tpu.memory_space<vmem>>, vector<64x16xbf16>
    %cst_58 = arith.constant dense<0.000000e+00> : vector<64x16xf32>
    %129 = tpu.matmul %124, %128, %cst_58 {dimension_numbers = #tpu.dot_dimension_numbers<[1], [0], [0], [1], [0, 0, 1, 1], [], []>} : vector<64x64xbf16>, vector<64x16xbf16>, vector<64x16xf32> -> vector<64x16xf32>
    %c0_59 = arith.constant 0 : index
    %c3 = arith.constant 3 : index
    %130 = memref.load %arg1[%c0_59, %c3] : memref<3x4xf32, #tpu.memory_space<smem>>
    %131 = vector.broadcast %130 : f32 to vector<64x64xf32>
    %132 = arith.mulf %10, %131 : vector<64x64xf32>
    %c1_60 = arith.constant 1 : index
    %c3_61 = arith.constant 3 : index
    %133 = memref.load %arg1[%c1_60, %c3_61] : memref<3x4xf32, #tpu.memory_space<smem>>
    %134 = vector.broadcast %133 : f32 to vector<64x64xf32>
    %135 = arith.mulf %14, %134 : vector<64x64xf32>
    %136 = arith.addf %132, %135 : vector<64x64xf32>
    %c2_62 = arith.constant 2 : index
    %c3_63 = arith.constant 3 : index
    %137 = memref.load %arg1[%c2_62, %c3_63] : memref<3x4xf32, #tpu.memory_space<smem>>
    %138 = vector.broadcast %137 : f32 to vector<64x64xf32>
    %139 = arith.mulf %18, %138 : vector<64x64xf32>
    %140 = arith.addf %136, %139 : vector<64x64xf32>
    %c0_64 = arith.constant 0 : index
    %c3_65 = arith.constant 3 : index
    %141 = vector.load %arg4[%c0_64, %c3_65] : memref<64x4xf32, #tpu.memory_space<vmem>>, vector<64x1xf32>
    %c3_66 = arith.constant 3 : index
    %c0_67 = arith.constant 0 : index
    %142 = vector.load %arg3[%c3_66, %c0_67] : memref<4x64xf32, #tpu.memory_space<vmem>>, vector<1x64xf32>
    %143 = vector.broadcast %141 : vector<64x1xf32> to vector<64x64xf32>
    %144 = vector.broadcast %142 : vector<1x64xf32> to vector<64x64xf32>
    %145 = arith.addf %143, %144 : vector<64x64xf32>
    %146 = arith.addf %145, %140 : vector<64x64xf32>
    %cst_68 = arith.constant 2.000000e-01 : f32
    %147 = vector.broadcast %cst_68 : f32 to vector<64x64xf32>
    %148 = arith.mulf %147, %146 : vector<64x64xf32>
    %149 = arith.maximumf %146, %148 : vector<64x64xf32>
    %150 = arith.addf %149, %6 : vector<64x64xf32>
    %cst_69 = arith.constant dense<0xFF800000> : vector<64xf32>
    %151 = vector.multi_reduction <maximumf>, %150, %cst_69 [1] : vector<64x64xf32> to vector<64xf32>
    %152 = vector.shape_cast %151 : vector<64xf32> to vector<64x1xf32>
    %153 = vector.broadcast %152 : vector<64x1xf32> to vector<64x64xf32>
    %154 = arith.subf %150, %153 : vector<64x64xf32>
    %155 = math.exp %154 : vector<64x64xf32>
    %cst_70 = arith.constant dense<0.000000e+00> : vector<64xf32>
    %156 = vector.multi_reduction <add>, %155, %cst_70 [1] : vector<64x64xf32> to vector<64xf32>
    %157 = vector.shape_cast %156 : vector<64xf32> to vector<64x1xf32>
    %158 = tpu.reciprocal %157 {approx = true} : vector<64x1xf32> -> vector<64x1xf32>
    %159 = vector.broadcast %158 : vector<64x1xf32> to vector<64x64xf32>
    %160 = arith.mulf %155, %159 : vector<64x64xf32>
    %161 = arith.truncf %160 : vector<64x64xf32> to vector<64x64xbf16>
    %c3_71 = arith.constant 3 : index
    %c0_72 = arith.constant 0 : index
    %c0_73 = arith.constant 0 : index
    %162 = vector.load %arg7[%c3_71, %c0_72, %c0_73] : memref<4x64x64xbf16, #tpu.memory_space<vmem>>, vector<1x64x64xbf16>
    %163 = vector.shape_cast %162 : vector<1x64x64xbf16> to vector<64x64xbf16>
    %164 = vector.shape_cast %161 : vector<64x64xbf16> to vector<1x64x64xbf16>
    tpu.vector_store %arg7[%c3_71, %c0_72, %c0_73], %164 {strides = array<i32>} : memref<4x64x64xbf16, #tpu.memory_space<vmem>>, vector<1x64x64xbf16>,
    %c0_74 = arith.constant 0 : index
    %c48 = arith.constant 48 : index
    %165 = vector.load %arg2[%c0_74, %c48] : memref<64x64xbf16, #tpu.memory_space<vmem>>, vector<64x16xbf16>
    %cst_75 = arith.constant dense<0.000000e+00> : vector<64x16xf32>
    %166 = tpu.matmul %161, %165, %cst_75 {dimension_numbers = #tpu.dot_dimension_numbers<[1], [0], [0], [1], [0, 0, 1, 1], [], []>} : vector<64x64xbf16>, vector<64x16xbf16>, vector<64x16xf32> -> vector<64x16xf32>
    %167 = tpu.concatenate %55, %92, %129, %166 in 1 : vector<64x16xf32>, vector<64x16xf32>, vector<64x16xf32>, vector<64x16xf32> -> vector<64x64xf32>
    %c0_76 = arith.constant 0 : index
    %c0_77 = arith.constant 0 : index
    %168 = vector.load %arg6[%c0_76, %c0_77] : memref<64x64xf32, #tpu.memory_space<vmem>>, vector<64x64xf32>
    tpu.vector_store %arg6[%c0_76, %c0_77], %167 {strides = array<i32>} : memref<64x64xf32, #tpu.memory_space<vmem>>, vector<64x64xf32>,
    return
  }
  func.func @transform_0(%arg0: i32) -> (i32, i32) {
    %c0_i32 = arith.constant 0 : i32
    %c0_i32_0 = arith.constant 0 : i32
    %c0_i32_1 = arith.constant 0 : i32
    return %c0_i32, %c0_i32_0 : i32, i32
  }
  func.func @transform_1(%arg0: i32) -> (i32, i32) {
    %c0_i32 = arith.constant 0 : i32
    %c0_i32_0 = arith.constant 0 : i32
    %c0_i32_1 = arith.constant 0 : i32
    return %c0_i32, %c0_i32_0 : i32, i32
  }
  func.func @transform_2(%arg0: i32) -> (i32, i32) {
    %c0_i32 = arith.constant 0 : i32
    %c0_i32_0 = arith.constant 0 : i32
    %c0_i32_1 = arith.constant 0 : i32
    return %c0_i32, %c0_i32_0 : i32, i32
  }
  func.func @transform_3(%arg0: i32) -> (i32, i32) {
    %c0_i32 = arith.constant 0 : i32
    %c0_i32_0 = arith.constant 0 : i32
    return %arg0, %c0_i32 : i32, i32
  }
  func.func @transform_4(%arg0: i32) -> (i32, i32) {
    %c0_i32 = arith.constant 0 : i32
    %c0_i32_0 = arith.constant 0 : i32
    return %arg0, %c0_i32 : i32, i32
  }
  func.func @transform_5(%arg0: i32) -> (i32, i32) {
    %c0_i32 = arith.constant 0 : i32
    %c0_i32_0 = arith.constant 0 : i32
    return %arg0, %c0_i32 : i32, i32
  }
  func.func @transform_6(%arg0: i32) -> (i32, i32, i32) {
    %c0_i32 = arith.constant 0 : i32
    %c0_i32_0 = arith.constant 0 : i32
    %c0_i32_1 = arith.constant 0 : i32
    return %c0_i32, %arg0, %c0_i32_0 : i32, i32, i32
  }
}

</mosaic_0001>

<bundles_post_ra>
// kernel: tpu_custom_call.1
= control target key start
LH: loop header
LB: loop body
LE: loop exit
PB: predicated region body
PF: predicated region fallthrough
CT: control target
= control target key end

     0   :  { %12 = vsyncpa [#allocation4], 0  ;;  %s3504_s0 = inlined_call_operand.vmem [shape: f32[3,4], index: 0, kind: input, shape index: {}]   ;;  %s3505_s1 = inlined_call_operand.vmem [shape: bf16[64,64], index: 1, kind: input, shape index: {}]   ;;  %s3506_s2 = inlined_call_operand.vmem [shape: f32[4,64], index: 2, kind: input, shape index: {}]   ;;  %s3507_s3 = inlined_call_operand.vmem [shape: f32[64,4], index: 3, kind: input, shape index: {}]   ;;  %s3508_s4 = inlined_call_operand.vmem [shape: s8[64,64], index: 4, kind: input, shape index: {}]   ;;  %s3509_s5 = inlined_call_operand.hbm [shape: f32[64,64], index: 5, kind: output, shape index: {0}]   ;;  %s3510_s6 = inlined_call_operand.hbm [shape: bf16[4,64,64], index: 6, kind: output, shape index: {1}]  }
   0x1   :  { %13 = vsyncpa [#allocation3], 0 }
   0x2   :  { %14 = vsyncpa [#allocation7], 0  ;;  %s21_s23 = sshll.u32 %s3504_s0, 4  ;;  %s22_s23 = int_to_ptr.vmem [resolvable:$true] %s21_s23 }
   0x3   :  { %s2247_s24 = scalar_lea.vmem %s22_s23, 64  ;;  %p2252_p1 = scmp.lt.s32.totalorder %s22_s23, %s22_s23 }
   0x4   :  { %p2248_p0 = scmp.ne.s32.totalorder %s22_s23, %s2247_s24  ;;  %p2253_p2 = scmp.lt.s32.totalorder %s2247_s24, %s2247_s24 }
   0x6   :  { %p2254_p3 = por %p2253_p2, %p2252_p1 }
   0x8   :  { %p2255_p4 = pnand %p2254_p3, %p2248_p0 }
   0xa   :  { %2258 = shalt.err (!%p2255_p4)
}
   0xb   :  { %s2305_s25 = smov [#allocation2]  }
   0xc   :  { %24 = dma.vmem_to_smem %s22_s23, 64, %s2305_s25, [#allocation4]  }
   0xd   :  { %2299 = dma.done.wait [#allocation4], 64  }
   0xe   :  { %2300 = vsyncadd [#allocation4], 4294967232 }
   0xf   :  { %36 = sfence }
  0x10   :  { %v192_v0 = vld [vmem:[%s3507_s3 + $0x10] sm:$0xff]  ;;  %v190_v1 = vld [vmem:[%s3507_s3] sm:$0xff]  ;;  %v2306_v2 = vmov 0   ;;  %v193_v3 = vld [vmem:[%s3507_s3 + $0x18] sm:$0xff]  ;;  %v2307_v6 = vmov 1   ;;  %v2308_v10 = vmov 2  }
  0x11   :  { %2092 = vset.pattern.permute.xlu1 %v2306_v2  ;;  %2091 = vset.pattern.permute.xlu0 %v2306_v2  ;;  %v191_v4 = vld [vmem:[%s3507_s3 + $0x8] sm:$0xff]  ;;  %v194_v7 = vld [vmem:[%s3507_s3 + $0x20] sm:$0xff]  ;;  %v196_v8 = vld [vmem:[%s3507_s3 + $0x30] sm:$0xff]  ;;  %v2309_v11 = vmov 3   ;;  %s144_s18 = sld [smem:[#allocation2]]  ;;  %v2310_v24 = vmov 0.0  }
  0x12   :  { %211 = vperm.xlu1 %2092, %v192_v0   ;;  %201 = vperm.xlu0 %2091, %v190_v1   ;;  %v195_v5 = vld [vmem:[%s3507_s3 + $0x28] sm:$0xff]  ;;  %v575_v9 = vld [vmem:[%s3507_s3 + $0x38] sm:$0xff]  ;;  %v38_v12 = vld [vmem:[%s3508_s4] sm:$0xff]  ;;  %s1865_s19 = sld [smem:[#allocation2 + $0x80]]  ;;  %s2312_s15 = smov 112  }
  0x13   :  { %v42_v13 = vunpack.c.2.s8 %v38_v12  ;;  %v40_v14 = vunpack.c.0.s8 %v38_v12  ;;  %v2392_v15 = vld [vmem:[%s3508_s4 + $0x8] sm:$0xff]  ;;  %v43_v17 = vunpack.c.3.s8 %v38_v12  ;;  %v41_v19 = vunpack.c.1.s8 %v38_v12  ;;  %s1866_s22 = sld [smem:[#allocation2 + $0x100]]  ;;  %s2313_s28 = smov 96  }
  0x14   :  { %v45_v20 = vunpack.c.1.s8 %v2392_v15  ;;  %v44_v29 = vunpack.c.0.s8 %v2392_v15  ;;  %s2429_s4 = sld [smem:[#allocation2 + $0x1]]  ;;  %s2317_s20 = smov 48  }
  0x15   :  { %v2394_v16 = vcvt.s32.f32 %v42_v13  ;;  %v2396_v18 = vcvt.s32.f32 %v40_v14  ;;  %v2401_v21 = vcvt.s32.f32 %v43_v17  ;;  %v2405_v22 = vcvt.s32.f32 %v41_v19  ;;  %s2437_s23 = sld [smem:[#allocation2 + $0x81]]  ;;  %s2318_s21 = smov [#allocation6]  }
  0x16   :  { %216 = vperm.xlu1 %2092, %v193_v3   ;;  %206 = vperm.xlu0 %2091, %v191_v4   ;;  %v2407_v23 = vcvt.s32.f32 %v45_v20  ;;  %s2455_s24 = sld [smem:[#allocation2 + $0x101]]  ;;  %v2512_v63 = vcvt.s32.f32 %v44_v29  ;;  %v3511_v14 = vmov -1e+30  }
  0x17   :  { %vm74_vm0 = vcmp.eq.f32.partialorder %v2394_v16, 1.0  ;;  %vm98_vm1 = vcmp.eq.f32.partialorder %v2394_v16, 2.0  ;;  %vm122_vm2 = vcmp.eq.f32.partialorder %v2394_v16, 3.0  ;;  %vm72_vm3 = vcmp.eq.f32.partialorder %v2396_v18, 1.0  ;;  %s2591_s25 = sld [smem:[#allocation2 + $0x2]] }
  0x18   :  { %v2410_v25 = vsel %vm74_vm0, 1.0, %v2310_v24  ;;  %v2413_v26 = vsel %vm98_vm1, 1.0, %v2310_v24  ;;  %v2415_v27 = vstv %s144_s18  ;;  %v2417_v28 = vstv %s1865_s19  ;;  %s2609_s26 = sld [smem:[#allocation2 + $0x82]] }
  0x19   :  { %vm96_vm4 = vcmp.eq.f32.partialorder %v2396_v18, 2.0  ;;  %v2422_v30 = vsel %vm122_vm2, 1.0, %v2310_v24  ;;  %v2425_v31 = vsel %vm72_vm3, 1.0, %v2310_v24  ;;  %vm75_vm5 = vcmp.eq.f32.partialorder %v2401_v21, 1.0  ;;  %s2638_s29 = sld [smem:[#allocation2 + $0x102]] }
  0x1a   :  { %2093 = vset.pattern.permute.xlu1 %v2307_v6  ;;  %226 = vperm.xlu0 %2091, %v195_v5   ;;  %3544 = vst [vmem:[#allocation11_spill] sm:$0xff] %v2422_v30  ;;  %vm99_vm6 = vcmp.eq.f32.partialorder %v2401_v21, 2.0  ;;  %v148_v32 = vmul.f32 %v2410_v25, %v2415_v27  ;;  %v158_v33 = vmul.f32 %v2413_v26, %v2417_v28  ;;  %vm73_vm7 = vcmp.eq.f32.partialorder %v2405_v22, 1.0  ;;  %s2762_s7 = sld [smem:[#allocation2 + $0x3]] }
  0x1b   :  { %584 = vperm.xlu1 %2093, %v191_v4   ;;  %vm97_vm8 = vcmp.eq.f32.partialorder %v2405_v22, 2.0  ;;  %v2439_v34 = vstv %s1866_s22  ;;  %v2442_v35 = vsel %vm96_vm4, 1.0, %v2310_v24  ;;  %vm77_vm9 = vcmp.eq.f32.partialorder %v2407_v23, 1.0  ;;  %s2768_s8 = sld [smem:[#allocation2 + $0x83]]  ;;  %s1825_s22 = sshll.u32 %s2318_s21, 4  ;;  %s1826_s22 = int_to_ptr.vmem [resolvable:$true] %s1825_s22 }
  0x1c   :  { %vm101_vm10 = vcmp.eq.f32.partialorder %v2407_v23, 2.0  ;;  %vm120_vm11 = vcmp.eq.f32.partialorder %v2396_v18, 3.0  ;;  %v146_v36 = vmul.f32 %v2425_v31, %v2415_v27  ;;  %v2450_v37 = vsel %vm75_vm5, 1.0, %v2310_v24  ;;  %s2775_s9 = sld [smem:[#allocation2 + $0x103]]  ;;  %p2264_p6 = scmp.lt.s32.totalorder %s1826_s22, %s1826_s22 }
  0x1d   :  { %v2453_v38 = vsel %vm99_vm6, 1.0, %v2310_v24  ;;  %vm123_vm12 = vcmp.eq.f32.partialorder %v2401_v21, 3.0  ;;  %v2459_v39 = vsel %vm73_vm7, 1.0, %v2310_v24  ;;  %v2462_v40 = vsel %vm97_vm8, 1.0, %v2310_v24 }
  0x1e   :  { %2095 = vset.pattern.permute.xlu0 %v2307_v6  ;;  %3545 = vst [vmem:[#allocation12_spill] sm:$0xff] %v2459_v39  ;;  %3546 = vst [vmem:[#allocation13_spill] sm:$0xff] %v2462_v40  ;;  %vm121_vm13 = vcmp.eq.f32.partialorder %v2405_v22, 3.0  ;;  %v156_v41 = vmul.f32 %v2442_v35, %v2417_v28  ;;  %v2468_v42 = vsel %vm77_vm9, 1.0, %v2310_v24  ;;  %v2471_v43 = vsel %vm101_vm10, 1.0, %v2310_v24 }
  0x1f   :  { %589 = vperm.xlu1 %2093, %v192_v0   ;;  %579 = vperm.xlu0 %2095, %v190_v1   ;;  %vm125_vm14 = vcmp.eq.f32.partialorder %v2407_v23, 3.0  ;;  %v176_v44 = vmul.f32 %v2422_v30, %v2439_v34  ;;  %v2477_v45 = vsel %vm120_vm11, 1.0, %v2310_v24  ;;  %v149_v46 = vmul.f32 %v2450_v37, %v2415_v27 }
  0x20   :  { %v159_v47 = vmul.f32 %v2453_v38, %v2417_v28  ;;  %v2484_v48 = vsel %vm123_vm12, 1.0, %v2310_v24  ;;  %v2487_v49 = vsel %vm121_vm13, 1.0, %v2310_v24  ;;  %v147_v50 = vmul.f32 %v2459_v39, %v2415_v27 }
  0x21   :  { %3547 = vst [vmem:[#allocation14_spill] sm:$0xff] %v2484_v48  ;;  %v157_v51 = vmul.f32 %v2462_v40, %v2417_v28  ;;  %v2494_v52 = vsel %vm125_vm14, 1.0, %v2310_v24  ;;  %v151_v53 = vmul.f32 %v2468_v42, %v2415_v27  ;;  %v161_v54 = vmul.f32 %v2471_v43, %v2417_v28 }
  0x22   :  { %3548 = vst [vmem:[#allocation15_spill] sm:$0xff] %v2494_v52  ;;  %v2501_v55 = vstv %s2429_s4  ;;  %v166_v56 = vadd.f32 %v158_v33, %v148_v32  ;;  %v164_v57 = vadd.f32 %v156_v41, %v146_v36  ;;  %v174_v58 = vmul.f32 %v2477_v45, %v2439_v34  ;;  %s2259_s4 = scalar_lea.vmem %s1826_s22, 2048 }
  0x23   :  { %2094 = vset.pattern.permute.xlu1 %v2306_v2  ;;  %594 = vperm.xlu0 %2095, %v193_v3   ;;  %v2506_v59 = vstv %s2437_s23  ;;  %v167_v60 = vadd.f32 %v159_v47, %v149_v46  ;;  %v177_v61 = vmul.f32 %v2484_v48, %v2439_v34  ;;  %v175_v62 = vmul.f32 %v2487_v49, %v2439_v34  ;;  %p2260_p5 = scmp.ne.s32.totalorder %s1826_s22, %s2259_s4  ;;  %p2265_p7 = scmp.lt.s32.totalorder %s2259_s4, %s2259_s4 }
  0x24   :  { %221 = vperm.xlu1 %2094, %v194_v7   ;;  %v2517_v2 = vstv %s2455_s24  ;;  %vm56_vm15 = vcmp.gt.f32.partialorder %v2396_v18, 0.5  ;;  %vm76_vm0 = vcmp.eq.f32.partialorder %v2512_v63, 1.0  ;;  %vm100_vm1 = vcmp.eq.f32.partialorder %v2512_v63, 2.0 }
  0x25   :  { %v553_v13 = vmul.f32 %v2487_v49, %v2517_v2  ;;  %v2542_v17 = vsel %vm56_vm15, 0.0, %v3511_v14  ;;  %v554_v20 = vmul.f32 %v2422_v30, %v2517_v2  ;;  %v524_v32 = vmul.f32 %v2425_v31, %v2501_v55  ;;  %p2266_p8 = por %p2265_p7, %p2264_p6 }
  0x26   :  { %v534_v33 = vmul.f32 %v2442_v35, %v2506_v59  ;;  %v2555_v36 = vsel %vm76_vm0, 1.0, %v2310_v24  ;;  %v2558_v41 = vsel %vm100_vm1, 1.0, %v2310_v24  ;;  %v552_v46 = vmul.f32 %v2477_v45, %v2517_v2 }
  0x27   :  { %599 = vperm.xlu0 %2095, %v194_v7   ;;  %3549 = vst [vmem:[#allocation16_spill] sm:$0xff] %v2555_v36  ;;  %3550 = vst [vmem:[#allocation17_spill] sm:$0xff] %v2558_v41  ;;  %vm124_vm2 = vcmp.eq.f32.partialorder %v2512_v63, 3.0  ;;  %v47_v47 = vunpack.c.3.s8 %v2392_v15  ;;  %vm57_vm3 = vcmp.gt.f32.partialorder %v2405_v22, 0.5  ;;  %vm59_vm4 = vcmp.gt.f32.partialorder %v2401_v21, 0.5  ;;  %p2267_p9 = pnand %p2266_p8, %p2260_p5 }
  0x28   :  { %231 = vperm.xlu1 %2094, %v196_v8   ;;  %v2579_v22 = vsel %vm124_vm2, 1.0, %v2310_v24  ;;  %vm58_vm8 = vcmp.gt.f32.partialorder %v2394_v16, 0.5  ;;  %vm283_vm11 = vcmask 523264   ;;  %vm60_vm13 = vcmp.gt.f32.partialorder %v2512_v63, 0.5 }
  0x29   :  { %3551 = vst [vmem:[#allocation18_spill] sm:$0xff] %v2579_v22  ;;  %vm61_vm14 = vcmp.gt.f32.partialorder %v2407_v23, 0.5  ;;  %vm404_vm1 = vcmask 519168  }
  0x2b   :  { %614 = vperm.xlu0 %2095, %v575_v9  }
  0x2c   :  { %236 = vperm.xlu1 %2094, %v575_v9  }
  0x2f   :  { %2098 = vset.pattern.permute.xlu0 %v2308_v10 }
  0x30   :  { %2096 = vset.pattern.permute.xlu1 %v2307_v6  ;;  %969 = vperm.xlu0 %2098, %v191_v4   ;;  %v46_v6 = vunpack.c.2.s8 %v2392_v15 }
  0x31   :  { %604 = vperm.xlu1 %2096, %v195_v5  }
  0x32   :  { %v2548_v29 = vcvt.s32.f32 %v46_v6  ;;  %v178_v6 = vmul.f32 %v2579_v22, %v2439_v34 }
  0x34   :  { %989 = vperm.xlu0 %2098, %v195_v5   ;;  %vm78_vm5 = vcmp.eq.f32.partialorder %v2548_v29, 1.0  ;;  %vm102_vm6 = vcmp.eq.f32.partialorder %v2548_v29, 2.0  ;;  %vm126_vm7 = vcmp.eq.f32.partialorder %v2548_v29, 3.0  ;;  %vm62_vm15 = vcmp.gt.f32.partialorder %v2548_v29, 0.5 }
  0x35   :  { %609 = vperm.xlu1 %2096, %v196_v8  }
  0x38   :  { %2101 = vset.pattern.permute.xlu0 %v2309_v11 }
  0x39   :  { %2097 = vset.pattern.permute.xlu1 %v2308_v10  ;;  %1349 = vperm.xlu0 %2101, %v190_v1  }
  0x3a   :  { %964 = vperm.xlu1 %2097, %v190_v1   ;;  %v179_v1 = vmul.f32 %v2494_v52, %v2439_v34 }
  0x3d   :  { %1364 = vperm.xlu0 %2101, %v193_v3  }
  0x3e   :  { %974 = vperm.xlu1 %2097, %v192_v0  }
  0x41   :  { %1369 = vperm.xlu0 %2101, %v194_v7  }
  0x42   :  { %979 = vperm.xlu1 %2097, %v193_v3   ;;  %v525_v3 = vmul.f32 %v2459_v39, %v2501_v55 }
  0x45   :  { %1384 = vperm.xlu0 %2101, %v575_v9  }
  0x46   :  { %2099 = vset.pattern.permute.xlu1 %v2309_v11 }
  0x47   :  { %1354 = vperm.xlu1 %2099, %v191_v4   ;;  %v169_v4 = vadd.f32 %v161_v54, %v151_v53  ;;  %v150_v53 = vmul.f32 %v2555_v36, %v2415_v27  ;;  %v160_v54 = vmul.f32 %v2558_v41, %v2417_v28 }
  0x49   :  { %v2544_v18 = vadd.f32 %v179_v1, %v169_v4  ;;  %v2601_v1 = vsel %vm78_vm5, 1.0, %v2310_v24 }
  0x4b   :  { %1359 = vperm.xlu1 %2099, %v192_v0   ;;  %v165_v0 = vadd.f32 %v157_v51, %v147_v50  ;;  %v527_v50 = vmul.f32 %v2450_v37, %v2501_v55  ;;  %v537_v51 = vmul.f32 %v2453_v38, %v2506_v59 }
  0x4d   :  { %v2537_v12 = vadd.f32 %v175_v62, %v165_v0  ;;  %v2596_v62 = vsel %vm59_vm4, 0.0, %v3511_v14  ;;  %v555_v0 = vmul.f32 %v2484_v48, %v2517_v2  ;;  %v545_v4 = vadd.f32 %v537_v51, %v527_v50 }
  0x4f   :  { %2100 = vset.pattern.permute.xlu1 %v2308_v10  ;;  %v536_v10 = vmul.f32 %v2413_v26, %v2506_v59 }
  0x50   :  { %984 = vperm.xlu1 %2100, %v194_v7   ;;  %v2525_v7 = vadd.f32 %v176_v44, %v166_v56  ;;  %v528_v56 = vmul.f32 %v2555_v36, %v2501_v55 }
  0x54   :  { %994 = vperm.xlu1 %2100, %v196_v8  }
  0x58   :  { %999 = vperm.xlu1 %2100, %v575_v9   ;;  %v526_v9 = vmul.f32 %v2410_v25, %v2501_v55 }
  0x5a   :  { %v544_v44 = vadd.f32 %v536_v10, %v526_v9  ;;  %v556_v10 = vmul.f32 %v2579_v22, %v2517_v2 }
  0x5c   :  { %2102 = vset.pattern.permute.xlu1 %v2309_v11  ;;  %v2535_v11 = vadd.f32 %v177_v61, %v167_v60  ;;  %v2586_v60 = vsel %vm57_vm3, 0.0, %v3511_v14  ;;  %v2589_v61 = vcvt.s32.f32 %v47_v47  ;;  %v2611_v21 = vadd.f32 %v554_v20, %v544_v44 }
  0x5d   :  { %1374 = vperm.xlu1 %2102, %v195_v5   ;;  %v535_v5 = vmul.f32 %v2462_v40, %v2506_v59  ;;  %v529_v44 = vmul.f32 %v2468_v42, %v2501_v55  ;;  %v539_v47 = vmul.f32 %v2471_v43, %v2506_v59 }
  0x5e   :  { %vm79_vm9 = vcmp.eq.f32.partialorder %v2589_v61, 1.0  ;;  %vm103_vm10 = vcmp.eq.f32.partialorder %v2589_v61, 2.0  ;;  %vm127_vm12 = vcmp.eq.f32.partialorder %v2589_v61, 3.0  ;;  %vm63_vm0 = vcmp.gt.f32.partialorder %v2589_v61, 0.5 }
  0x5f   :  { %v543_v19 = vadd.f32 %v535_v5, %v525_v3  ;;  %v2604_v3 = vsel %vm102_vm6, 1.0, %v2310_v24  ;;  %v168_v5 = vadd.f32 %v160_v54, %v150_v53  ;;  %v2640_v53 = vadd.f32 %v555_v0, %v545_v4 }
  0x60   :  { %v162_v16 = vmul.f32 %v2604_v3, %v2417_v28  ;;  %v2657_v0 = vsel %vm103_vm10, 1.0, %v2310_v24  ;;  %v2669_v22 = vsel %vm127_vm12, 1.0, %v2310_v24 }
  0x61   :  { %1379 = vperm.xlu1 %2102, %v196_v8   ;;  %v2527_v8 = vadd.f32 %v174_v58, %v164_v57  ;;  %v2576_v15 = vadd.f32 %v553_v13, %v543_v19  ;;  %v538_v57 = vmul.f32 %v2558_v41, %v2506_v59  ;;  %v542_v58 = vadd.f32 %v534_v33, %v524_v32  ;;  %v2621_v19 = vld [vmem:[%s3506_s2] ss:$0 sm:$0xff] }
  0x62   :  { %v2616_v13 = vsel %vm126_vm7, 1.0, %v2310_v24  ;;  %v152_v32 = vmul.f32 %v2601_v1, %v2415_v27  ;;  %v2632_v33 = vsel %vm58_vm8, 0.0, %v3511_v14  ;;  %v2642_v54 = vadd.f32 %v178_v6, %v168_v5  ;;  %3553 = vst [vmem:[#allocation20_spill] sm:$0xff] %v2657_v0  ;;  %3554 = vst [vmem:[#allocation21_spill] sm:$0xff] %v2669_v22 }
  0x63   :  { %v546_v9 = vadd.f32 %v538_v57, %v528_v56  ;;  %v2629_v20 = vadd.f32 %v552_v46, %v542_v58  ;;  %v180_v46 = vmul.f32 %v2616_v13, %v2439_v34  ;;  %v2652_v58 = vsel %vm79_vm9, 1.0, %v2310_v24 }
  0x64   :  { %3552 = vst [vmem:[#allocation19_spill] sm:$0xff] %v2652_v58  ;;  %v170_v5 = vadd.f32 %v162_v16, %v152_v32  ;;  %v557_v6 = vmul.f32 %v2494_v52, %v2517_v2  ;;  %v547_v41 = vadd.f32 %v539_v47, %v529_v44  ;;  %v153_v32 = vmul.f32 %v2652_v58, %v2415_v27 }
  0x65   :  { %v2659_v4 = vadd.f32 %v556_v10, %v546_v9  ;;  %v531_v9 = vmul.f32 %v2652_v58, %v2501_v55  ;;  %v541_v10 = vmul.f32 %v2657_v0, %v2506_v59  ;;  %v2678_v16 = vstv %s2609_s26 }
  0x66   :  { %v163_v44 = vmul.f32 %v2657_v0, %v2417_v28  ;;  %v181_v52 = vmul.f32 %v2669_v22, %v2439_v34  ;;  %v2698_v28 = vstv %s2638_s29  ;;  %v2700_v0 = vadd.f32 %v557_v6, %v547_v41 }
  0x67   :  { %v920_v34 = vmul.f32 %v2462_v40, %v2678_v16  ;;  %v938_v41 = vmul.f32 %v2487_v49, %v2698_v28  ;;  %v919_v29 = vmul.f32 %v2442_v35, %v2678_v16 }
  0x8d   :  { %v212_v50 = vpop.permute.xlu1 %211  ;;  %v202_v51 = vpop.permute.xlu0 %201 }
  0x8e   :  { %v245_v56 = vadd.f32 %v2621_v19, %v212_v50  ;;  %v243_v57 = vadd.f32 %v2621_v19, %v202_v51  ;;  %v2664_v50 = vstv %s2591_s25 }
  0x8f   :  { %v910_v30 = vmul.f32 %v2459_v39, %v2664_v50 }
  0x90   :  { %v253_v51 = vadd.f32 %v245_v56, %v2525_v7  ;;  %v251_v14 = vadd.f32 %v243_v57, %v2527_v8  ;;  %v2684_v56 = vadd.f32 %v180_v46, %v170_v5  ;;  %v559_v57 = vmul.f32 %v2669_v22, %v2517_v2 }
  0x91   :  { %v217_v36 = vpop.permute.xlu1 %216  ;;  %v207_v48 = vpop.permute.xlu0 %206  ;;  %v549_v5 = vadd.f32 %v541_v10, %v531_v9  ;;  %v171_v22 = vadd.f32 %v163_v44, %v153_v32  ;;  %v928_v32 = vadd.f32 %v920_v34, %v910_v30 }
  0x92   :  { %v259_v7 = vmul.f32 0.2, %v251_v14  ;;  %v246_v8 = vadd.f32 %v2621_v19, %v217_v36  ;;  %v244_v24 = vadd.f32 %v2621_v19, %v207_v48  ;;  %v261_v47 = vmul.f32 0.2, %v253_v51  ;;  %v2695_v48 = vld [vmem:[%s3506_s2 + $0x1] ss:$0 sm:$0xff] }
  0x94   :  { %v254_v27 = vadd.f32 %v246_v8, %v2535_v11  ;;  %v252_v58 = vadd.f32 %v244_v24, %v2537_v12  ;;  %v267_v36 = vmax.f32 %v251_v14, %v259_v7  ;;  %v269_v7 = vmax.f32 %v253_v51, %v261_v47 }
  0x95   :  { %v227_v46 = vpop.permute.xlu0 %226 }
  0x96   :  { %v262_v11 = vmul.f32 0.2, %v254_v27  ;;  %v260_v12 = vmul.f32 0.2, %v252_v58  ;;  %v585_v8 = vpop.permute.xlu1 %584  ;;  %v2707_v24 = vadd.f32 %v267_v36, %v2542_v17  ;;  %v248_v6 = vadd.f32 %v2621_v19, %v227_v46 }
  0x97   :  { %v622_v14 = vadd.f32 %v2695_v48, %v585_v8  ;;  %v2717_v36 = vadd.f32 %v559_v57, %v549_v5  ;;  %v2726_v46 = vadd.f32 %v181_v52, %v171_v22  ;;  %v530_v5 = vmul.f32 %v2601_v1, %v2501_v55 }
  0x98   :  { %v284_v9 = vsel %vm283_vm11, %v2707_v24, -inf  ;;  %v268_v10 = vmax.f32 %v252_v58, %v260_v12  ;;  %v270_v40 = vmax.f32 %v254_v27, %v262_v11  ;;  %v3555_v58 = vmov -1e+30  }
  0x99   :  { %v630_v39 = vadd.f32 %v622_v14, %v2576_v15  ;;  %285 = vmax.xlane.f32.xlu1 %v284_v9  ;;  %v2729_v27 = vsel %vm60_vm13, 0.0, %v3555_v58  ;;  %v2736_v34 = vadd.f32 %v248_v6, %v2544_v18  ;;  %v2743_v22 = vadd.f32 %v269_v7, %v2632_v33 }
  0x9a   :  { %v590_v51 = vpop.permute.xlu1 %589  ;;  %v580_v44 = vpop.permute.xlu0 %579  ;;  %v2721_v47 = vadd.f32 %v268_v10, %v2586_v60  ;;  %v2724_v63 = vadd.f32 %v270_v40, %v2596_v62  ;;  %v2750_v55 = vsel %vm61_vm14, 0.0, %v3555_v58  ;;  %v2752_v14 = vadd.f32 %v938_v41, %v928_v32 }
  0x9b   :  { %v638_v15 = vmul.f32 0.2, %v630_v39  ;;  %v623_v57 = vadd.f32 %v2695_v48, %v590_v51  ;;  %v621_v30 = vadd.f32 %v2695_v48, %v580_v44  ;;  %v540_v6 = vmul.f32 %v2604_v3, %v2506_v59 }
  0x9c   :  { %v287_v40 = vsel %vm283_vm11, %v2721_v47, -inf  ;;  %v293_v52 = vsel %vm283_vm11, %v2724_v63, -inf  ;;  %v558_v7 = vmul.f32 %v2616_v13, %v2517_v2  ;;  %v264_v59 = vmul.f32 0.2, %v2736_v34 }
  0x9d   :  { %v631_v11 = vadd.f32 %v623_v57, %v2611_v21  ;;  %v629_v12 = vadd.f32 %v621_v30, %v2629_v20  ;;  %288 = vmax.xlane.f32.xlu0 %v287_v40  ;;  %294 = vmax.xlane.f32.xlu1 %v293_v52  ;;  %v646_v8 = vmax.f32 %v630_v39, %v638_v15  ;;  %v290_v10 = vsel %vm283_vm11, %v2743_v22, -inf }
  0x9e   :  { %v595_v18 = vpop.permute.xlu0 %594  ;;  %v2760_v21 = vmul.f32 %v2468_v42, %v2664_v50  ;;  %v548_v40 = vadd.f32 %v540_v6, %v530_v5  ;;  %v2783_v52 = vmul.f32 %v2471_v43, %v2678_v16  ;;  %v272_v5 = vmax.f32 %v2736_v34, %v264_v59 }
  0x9f   :  { %v639_v39 = vmul.f32 0.2, %v631_v11  ;;  %v637_v20 = vmul.f32 0.2, %v629_v12  ;;  %v624_v23 = vadd.f32 %v2695_v48, %v595_v18  ;;  %v222_v9 = vpop.permute.xlu1 %221  ;;  %v2766_v41 = vadd.f32 %v646_v8, %v2586_v60 }
  0xa0   :  { %v247_v2 = vadd.f32 %v2621_v19, %v222_v9  ;;  %v2797_v6 = vsel %vm62_vm15, 0.0, %v3555_v58  ;;  %v566_v59 = vadd.f32 %v558_v7, %v548_v40  ;;  %v2829_v40 = vld [vmem:[%s3506_s2 + $0x2] ss:$0 sm:$0xff] }
  0xa1   :  { %3556 = vst [vmem:[#allocation22_spill] sm:$0xff] %v2766_v41  ;;  %v632_v32 = vadd.f32 %v624_v23, %v2640_v53  ;;  %291 = vmax.xlane.f32.xlu0 %v290_v10  ;;  %v664_v51 = vsel %vm283_vm11, %v2766_v41, -inf  ;;  %v645_v44 = vmax.f32 %v629_v12, %v637_v20  ;;  %v647_v15 = vmax.f32 %v631_v11, %v639_v39 }
  0xa2   :  { %v255_v57 = vadd.f32 %v247_v2, %v2642_v54  ;;  %v600_v30 = vpop.permute.xlu0 %599  ;;  %665 = vmax.xlane.f32.xlu1 %v664_v51  ;;  %v909_v11 = vmul.f32 %v2425_v31, %v2664_v50 }
  0xa3   :  { %v640_v8 = vmul.f32 0.2, %v632_v32  ;;  %v625_v53 = vadd.f32 %v2695_v48, %v600_v30  ;;  %v232_v18 = vpop.permute.xlu1 %231  ;;  %v2788_v23 = vadd.f32 %v645_v44, %v2542_v17  ;;  %v2803_v9 = vadd.f32 %v647_v15, %v2632_v33 }
  0xa4   :  { %v263_v54 = vmul.f32 0.2, %v255_v57  ;;  %v249_v12 = vadd.f32 %v2621_v19, %v232_v18  ;;  %v2816_v15 = vstv %s2768_s8  ;;  %v2820_v18 = vstv %s2775_s9 }
  0xa5   :  { %3557 = vst [vmem:[#allocation23_spill] sm:$0xff] %v2788_v23  ;;  %v633_v39 = vadd.f32 %v625_v53, %v2659_v4  ;;  %v661_v20 = vsel %vm283_vm11, %v2788_v23, -inf  ;;  %3558 = vst [vmem:[#allocation24_spill] sm:$0xff] %v2803_v9  ;;  %v648_v2 = vmax.f32 %v632_v32, %v640_v8  ;;  %v2813_v53 = vstv %s2762_s7 }
  0xa6   :  { %v257_v10 = vadd.f32 %v249_v12, %v2684_v56  ;;  %v615_v51 = vpop.permute.xlu0 %614  ;;  %662 = vmax.xlane.f32.xlu0 %v661_v20  ;;  %v271_v34 = vmax.f32 %v255_v57, %v263_v54  ;;  %v667_v7 = vsel %vm283_vm11, %v2803_v9, -inf  ;;  %v2835_v12 = vadd.f32 %v272_v5, %v2750_v55  ;;  %v3565_v9 = vld [vmem:[#allocation14_spill] sm:$0xff] }
  0xa7   :  { %v628_v44 = vadd.f32 %v2695_v48, %v615_v51  ;;  %v237_v4 = vpop.permute.xlu1 %236  ;;  %v2810_v30 = vadd.f32 %v648_v2, %v2596_v62  ;;  %v641_v32 = vmul.f32 0.2, %v633_v39  ;;  %v2841_v2 = vsel %vm63_vm0, 0.0, %v3555_v58 }
  0xa8   :  { %v265_v8 = vmul.f32 0.2, %v257_v10  ;;  %v250_v56 = vadd.f32 %v2621_v19, %v237_v4  ;;  %v2832_v54 = vadd.f32 %v271_v34, %v2729_v27  ;;  %3561 = vst [vmem:[#allocation27_spill] sm:$0xff] %v2835_v12  ;;  %v937_v51 = vmul.f32 %v2477_v45, %v2698_v28 }
  0xa9   :  { %3559 = vst [vmem:[#allocation25_spill] sm:$0xff] %v2810_v30  ;;  %v670_v57 = vsel %vm283_vm11, %v2810_v30, -inf  ;;  %v2846_v4 = vadd.f32 %v628_v44, %v2717_v36  ;;  %v927_v30 = vadd.f32 %v919_v29, %v909_v11  ;;  %v1294_v5 = vmul.f32 %v2425_v31, %v2813_v53 }
  0xaa   :  { %3560 = vst [vmem:[#allocation26_spill] sm:$0xff] %v2832_v54  ;;  %v258_v19 = vadd.f32 %v250_v56, %v2726_v46  ;;  %668 = vmax.xlane.f32.xlu0 %v667_v7  ;;  %671 = vmax.xlane.f32.xlu1 %v670_v57  ;;  %v273_v20 = vmax.f32 %v257_v10, %v265_v8  ;;  %v296_v36 = vsel %vm283_vm11, %v2832_v54, -inf  ;;  %v299_v11 = vsel %vm283_vm11, %v2835_v12, -inf  ;;  %v3564_v12 = vld [vmem:[#allocation11_spill] sm:$0xff] }
  0xab   :  { %v970_v34 = vpop.permute.xlu0 %969  ;;  %v1304_v46 = vmul.f32 %v2442_v35, %v2816_v15  ;;  %v1322_v58 = vmul.f32 %v2477_v45, %v2820_v18  ;;  %v649_v56 = vmax.f32 %v633_v39, %v641_v32  ;;  %v911_v45 = vmul.f32 %v2410_v25, %v2664_v50 }
  0xac   :  { %v266_v10 = vmul.f32 0.2, %v258_v19  ;;  %v605_v8 = vpop.permute.xlu1 %604  ;;  %v1007_v61 = vadd.f32 %v2829_v40, %v970_v34  ;;  %v2861_v31 = vadd.f32 %v273_v20, %v2797_v6  ;;  %v644_v39 = vmul.f32 0.2, %v2846_v4 }
  0xad   :  { %v626_v7 = vadd.f32 %v2695_v48, %v605_v8  ;;  %v1312_v57 = vadd.f32 %v1304_v46, %v1294_v5  ;;  %v921_v34 = vmul.f32 %v2413_v26, %v2678_v16  ;;  %v939_v54 = vmul.f32 %v3564_v12, %v2698_v28 }
  0xae   :  { %3562 = vst [vmem:[#allocation28_spill] sm:$0xff] %v2861_v31  ;;  %v1015_v35 = vadd.f32 %v1007_v61, %v2752_v14  ;;  %297 = vmax.xlane.f32.xlu0 %v296_v36  ;;  %300 = vmax.xlane.f32.xlu1 %v299_v11  ;;  %v274_v29 = vmax.f32 %v258_v19, %v266_v10  ;;  %v302_v5 = vsel %vm283_vm11, %v2861_v31, -inf }
  0xaf   :  { %v634_v44 = vadd.f32 %v626_v7, %v2700_v0  ;;  %v2868_v32 = vpop.permute.xlu0 %989  ;;  %v945_v14 = vadd.f32 %v937_v51, %v927_v30  ;;  %v2876_v19 = vadd.f32 %v649_v56, %v2729_v27  ;;  %v1297_v10 = vmul.f32 %v2450_v37, %v2813_v53  ;;  %v2888_v30 = vld [vmem:[%s3506_s2 + $0x3] ss:$0 sm:$0xff]  ;;  %s2314_s2 = smov 80  }
  0xb0   :  { %v610_v20 = vpop.permute.xlu1 %609  ;;  %v2873_v8 = vadd.f32 %v274_v29, %v2841_v2  ;;  %v1023_v36 = vmul.f32 0.2, %v1015_v35  ;;  %v1307_v51 = vmul.f32 %v2453_v38, %v2816_v15  ;;  %v912_v56 = vmul.f32 %v2450_v37, %v2664_v50 }
  0xb1   :  { %v642_v61 = vmul.f32 0.2, %v634_v44  ;;  %v627_v0 = vadd.f32 %v2695_v48, %v610_v20  ;;  %v922_v48 = vmul.f32 %v2453_v38, %v2678_v16  ;;  %v1330_v11 = vadd.f32 %v1322_v58, %v1312_v57 }
  0xb2   :  { %3563 = vst [vmem:[#allocation29_spill] sm:$0xff] %v2873_v8  ;;  %303 = vmax.xlane.f32.xlu0 %v302_v5  ;;  %v305_v46 = vsel %vm283_vm11, %v2873_v8, -inf  ;;  %v652_v20 = vmax.f32 %v2846_v4, %v644_v39  ;;  %v673_v8 = vsel %vm283_vm11, %v2876_v19, -inf  ;;  %v929_v31 = vadd.f32 %v921_v34, %v911_v45 }
  0xb3   :  { %v635_v7 = vadd.f32 %v627_v0, %v566_v59  ;;  %306 = vmax.xlane.f32.xlu1 %v305_v46  ;;  %v650_v29 = vmax.f32 %v634_v44, %v642_v61  ;;  %v1325_v37 = vmul.f32 %v3565_v9, %v2820_v18  ;;  %v1031_v58 = vmax.f32 %v1015_v35, %v1023_v36  ;;  %v3566_v35 = vld [vmem:[#allocation15_spill] sm:$0xff] }
  0xb4   :  { %v1350_v5 = vpop.permute.xlu0 %1349  ;;  %v1315_v39 = vadd.f32 %v1307_v51, %v1297_v10  ;;  %v930_v44 = vadd.f32 %v922_v48, %v912_v56  ;;  %v940_v45 = vmul.f32 %v3565_v9, %v2698_v28  ;;  %v2913_v0 = vadd.f32 %v652_v20, %v2841_v2  ;;  %v3568_v48 = vld [vmem:[#allocation13_spill] sm:$0xff] }
  0xb5   :  { %v643_v23 = vmul.f32 0.2, %v635_v7  ;;  %v965_v41 = vpop.permute.xlu1 %964  ;;  %v1391_v38 = vadd.f32 %v2888_v30, %v1350_v5  ;;  %v2905_v59 = vadd.f32 %v650_v29, %v2750_v55  ;;  %v932_v46 = vadd.f32 %v2783_v52, %v2760_v21 }
  0xb6   :  { %v1006_v4 = vadd.f32 %v2829_v40, %v965_v41  ;;  %674 = vmax.xlane.f32.xlu0 %v673_v8  ;;  %v942_v41 = vmul.f32 %v3566_v35, %v2698_v28  ;;  %v947_v10 = vadd.f32 %v939_v54, %v929_v31  ;;  %v2923_v51 = vadd.f32 %v1031_v58, %v2586_v60 }
  0xb7   :  { %v1399_v57 = vadd.f32 %v1391_v38, %v1330_v11  ;;  %v676_v34 = vsel %vm283_vm11, %v2905_v59, -inf  ;;  %v651_v61 = vmax.f32 %v635_v7, %v643_v23  ;;  %v3567_v23 = vld [vmem:[#allocation12_spill] sm:$0xff]  ;;  %v1305_v7 = vmul.f32 %v3568_v48, %v2816_v15  ;;  %v3570_v48 = vld [vmem:[#allocation17_spill] sm:$0xff] }
  0xb8   :  { %v1014_v8 = vadd.f32 %v1006_v4, %v945_v14  ;;  %677 = vmax.xlane.f32.xlu1 %v676_v34  ;;  %v1295_v56 = vmul.f32 %v3567_v23, %v2813_v53  ;;  %v1333_v14 = vadd.f32 %v1325_v37, %v1315_v39  ;;  %v682_v31 = vsel %vm283_vm11, %v2913_v0, -inf  ;;  %v1365_v38 = vpop.permute.xlu0 %1364 }
  0xb9   :  { %v975_v36 = vpop.permute.xlu1 %974  ;;  %v2920_v9 = vadd.f32 %v651_v61, %v2797_v6  ;;  %v1407_v52 = vmul.f32 0.2, %v1399_v57  ;;  %v948_v29 = vadd.f32 %v940_v45, %v930_v44  ;;  %v1323_v20 = vmul.f32 %v2487_v49, %v2820_v18 }
  0xba   :  { %v1022_v21 = vmul.f32 0.2, %v1014_v8  ;;  %v1008_v11 = vadd.f32 %v2829_v40, %v975_v36  ;;  %v1296_v4 = vmul.f32 %v2410_v25, %v2813_v53  ;;  %v1394_v37 = vadd.f32 %v2888_v30, %v1365_v38  ;;  %v3569_v25 = vld [vmem:[#allocation16_spill] sm:$0xff] }
  0xbb   :  { %v679_v54 = vsel %vm283_vm11, %v2920_v9, -inf  ;;  %v1049_v34 = vsel %vm283_vm11, %v2923_v51, -inf  ;;  %v1313_v61 = vadd.f32 %v1305_v7, %v1295_v56  ;;  %v1306_v44 = vmul.f32 %v2413_v26, %v2816_v15 }
  0xbc   :  { %v1016_v5 = vadd.f32 %v1008_v11, %v947_v10  ;;  %680 = vmax.xlane.f32.xlu0 %v679_v54  ;;  %683 = vmax.xlane.f32.xlu1 %v682_v31  ;;  %v1030_v58 = vmax.f32 %v1014_v8, %v1022_v21  ;;  %v1415_v8 = vmax.f32 %v1399_v57, %v1407_v52 }
  0xbd   :  { %v980_v39 = vpop.permute.xlu1 %979  ;;  %v950_v36 = vadd.f32 %v942_v41, %v932_v46  ;;  %v1298_v23 = vmul.f32 %v3569_v25, %v2813_v53  ;;  %v1308_v21 = vmul.f32 %v3570_v48, %v2816_v15  ;;  %v1324_v56 = vmul.f32 %v3564_v12, %v2820_v18 }
  0xbe   :  { %v1024_v45 = vmul.f32 0.2, %v1016_v5  ;;  %v1009_v49 = vadd.f32 %v2829_v40, %v980_v39  ;;  %v2945_v10 = vadd.f32 %v1030_v58, %v2542_v17  ;;  %v913_v54 = vmul.f32 %v3569_v25, %v2664_v50  ;;  %v3573_v39 = vld [vmem:[#allocation18_spill] sm:$0xff] }
  0xbf   :  { %v1011_v57 = vadd.f32 %v2829_v40, %v2868_v32  ;;  %v1402_v46 = vadd.f32 %v1394_v37, %v1333_v14  ;;  %v1331_v41 = vadd.f32 %v1323_v20, %v1313_v61  ;;  %v1314_v52 = vadd.f32 %v1306_v44, %v1296_v4  ;;  %v3574_v32 = vld [vmem:[#allocation19_spill] sm:$0xff] }
  0xc0   :  { %v1017_v7 = vadd.f32 %v1009_v49, %v948_v29  ;;  %1050 = vmax.xlane.f32.xlu1 %v1049_v34  ;;  %v1046_v26 = vsel %vm283_vm11, %v2945_v10, -inf  ;;  %v1032_v11 = vmax.f32 %v1016_v5, %v1024_v45  ;;  %v2963_v29 = vadd.f32 %v1415_v8, %v2542_v17 }
  0xc1   :  { %1047 = vmax.xlane.f32.xlu0 %v1046_v26  ;;  %v923_v5 = vmul.f32 %v3570_v48, %v2678_v16  ;;  %v1316_v58 = vadd.f32 %v1308_v21, %v1298_v23  ;;  %v1326_v34 = vmul.f32 %v3573_v39, %v2820_v18  ;;  %v1301_v14 = vmul.f32 %v3574_v32, %v2813_v53  ;;  %v3576_v26 = vld [vmem:[#allocation20_spill] sm:$0xff] }
  0xc2   :  { %v1025_v31 = vmul.f32 0.2, %v1017_v7  ;;  %v1355_v38 = vpop.permute.xlu1 %1354  ;;  %v2960_v12 = vadd.f32 %v1032_v11, %v2632_v33  ;;  %3572 = vst [vmem:[#allocation14_spill] sm:$0xff] %v2963_v29  ;;  %v915_v17 = vmul.f32 %v2601_v1, %v2664_v50  ;;  %v925_v61 = vmul.f32 %v2604_v3, %v2678_v16 }
  0xc3   :  { %v1392_v20 = vadd.f32 %v2888_v30, %v1355_v38  ;;  %v1019_v44 = vadd.f32 %v1011_v57, %v950_v36  ;;  %v1410_v45 = vmul.f32 0.2, %v1402_v46  ;;  %v1332_v8 = vadd.f32 %v1324_v56, %v1314_v52 }
  0xc4   :  { %3571 = vst [vmem:[#allocation11_spill] sm:$0xff] %v2960_v12  ;;  %v1052_v4 = vsel %vm283_vm11, %v2960_v12, -inf  ;;  %v1033_v37 = vmax.f32 %v1017_v7, %v1025_v31  ;;  %v1431_v23 = vsel %vm283_vm11, %v2963_v29, -inf  ;;  %v931_v21 = vadd.f32 %v923_v5, %v913_v54  ;;  %v1370_v5 = vpop.permute.xlu0 %1369 }
  0xc5   :  { %v1400_v49 = vadd.f32 %v1392_v20, %v1331_v41  ;;  %1053 = vmax.xlane.f32.xlu0 %v1052_v4  ;;  %v941_v7 = vmul.f32 %v3573_v39, %v2698_v28  ;;  %v1311_v11 = vmul.f32 %v3576_v26, %v2816_v15  ;;  %v943_v56 = vmul.f32 %v2616_v13, %v2698_v28 }
  0xc6   :  { %v1360_v25 = vpop.permute.xlu1 %1359  ;;  %v2981_v48 = vadd.f32 %v1033_v37, %v2596_v62  ;;  %v933_v41 = vadd.f32 %v925_v61, %v915_v17  ;;  %v916_v52 = vmul.f32 %v3574_v32, %v2664_v50  ;;  %v926_v54 = vmul.f32 %v3576_v26, %v2678_v16  ;;  %v3577_v17 = vld [vmem:[#allocation21_spill] sm:$0xff] }
  0xc7   :  { %v1408_v31 = vmul.f32 0.2, %v1400_v49  ;;  %v1393_v36 = vadd.f32 %v2888_v30, %v1360_v25  ;;  %v1027_v38 = vmul.f32 0.2, %v1019_v44  ;;  %v1418_v4 = vmax.f32 %v1402_v46, %v1410_v45 }
  0xc8   :  { %3575 = vst [vmem:[#allocation15_spill] sm:$0xff] %v2981_v48  ;;  %v1055_v57 = vsel %vm283_vm11, %v2981_v48, -inf  ;;  %v1334_v37 = vadd.f32 %v1326_v34, %v1316_v58  ;;  %v1395_v25 = vadd.f32 %v2888_v30, %v1370_v5  ;;  %v949_v29 = vadd.f32 %v941_v7, %v931_v21 }
  0xc9   :  { %v1401_v39 = vadd.f32 %v1393_v36, %v1332_v8  ;;  %1432 = vmax.xlane.f32.xlu0 %v1431_v23  ;;  %1056 = vmax.xlane.f32.xlu1 %v1055_v57  ;;  %v1416_v20 = vmax.f32 %v1400_v49, %v1408_v31  ;;  %v1319_v12 = vadd.f32 %v1311_v11, %v1301_v14  ;;  %v1385_v11 = vpop.permute.xlu0 %1384 }
  0xca   :  { %v1329_v61 = vmul.f32 %v3577_v17, %v2820_v18  ;;  %v951_v8 = vadd.f32 %v943_v56, %v933_v41  ;;  %v934_v23 = vadd.f32 %v926_v54, %v916_v52  ;;  %v944_v46 = vmul.f32 %v3577_v17, %v2698_v28 }
  0xcb   :  { %v1409_v48 = vmul.f32 0.2, %v1401_v39  ;;  %v985_v50 = vpop.permute.xlu1 %984  ;;  %v3000_v32 = vadd.f32 %v1416_v20, %v2586_v60  ;;  %v3008_v14 = vadd.f32 %v1418_v4, %v2596_v62  ;;  %v1035_v45 = vmax.f32 %v1019_v44, %v1027_v38 }
  0xcc   :  { %v1010_v16 = vadd.f32 %v2829_v40, %v985_v50  ;;  %v1403_v49 = vadd.f32 %v1395_v25, %v1334_v37  ;;  %v1299_v60 = vmul.f32 %v2468_v42, %v2813_v53  ;;  %v1309_v7 = vmul.f32 %v2471_v43, %v2816_v15 }
  0xcd   :  { %v1434_v58 = vsel %vm283_vm11, %v3000_v32, -inf  ;;  %v1417_v34 = vmax.f32 %v1401_v39, %v1409_v48  ;;  %v1337_v31 = vadd.f32 %v1329_v61, %v1319_v12  ;;  %v952_v36 = vadd.f32 %v944_v46, %v934_v23 }
  0xce   :  { %v1018_v21 = vadd.f32 %v1010_v16, %v949_v29  ;;  %1435 = vmax.xlane.f32.xlu1 %v1434_v58  ;;  %v1440_v29 = vsel %vm283_vm11, %v3008_v14, -inf  ;;  %v3023_v42 = vadd.f32 %v1035_v45, %v2750_v55  ;;  %v1411_v43 = vmul.f32 0.2, %v1403_v49 }
  0xcf   :  { %v995_v26 = vpop.permute.xlu1 %994  ;;  %v3015_v28 = vadd.f32 %v1417_v34, %v2632_v33  ;;  %v1317_v57 = vadd.f32 %v1309_v7, %v1299_v60  ;;  %v1398_v12 = vadd.f32 %v2888_v30, %v1385_v11  ;;  %v1327_v52 = vmul.f32 %v3566_v35, %v2820_v18 }
  0xd0   :  { %v1026_v48 = vmul.f32 0.2, %v1018_v21  ;;  %v1012_v62 = vadd.f32 %v2829_v40, %v995_v26  ;;  %v1300_v54 = vmul.f32 %v2601_v1, %v2813_v53  ;;  %v1310_v38 = vmul.f32 %v2604_v3, %v2816_v15 }
  0xd1   :  { %v1437_v44 = vsel %vm283_vm11, %v3015_v28, -inf  ;;  %v1061_v4 = vsel %vm283_vm11, %v3023_v42, -inf  ;;  %v1419_v17 = vmax.f32 %v1403_v49, %v1411_v43  ;;  %v1406_v1 = vadd.f32 %v1398_v12, %v1337_v31 }
  0xd2   :  { %v1020_v56 = vadd.f32 %v1012_v62, %v951_v8  ;;  %1438 = vmax.xlane.f32.xlu0 %v1437_v44  ;;  %1441 = vmax.xlane.f32.xlu1 %v1440_v29  ;;  %v1034_v33 = vmax.f32 %v1018_v21, %v1026_v48  ;;  %v1335_v53 = vadd.f32 %v1327_v52, %v1317_v57 }
  0xd3   :  { %v1000_v41 = vpop.permute.xlu1 %999  ;;  %v1318_v3 = vadd.f32 %v1310_v38, %v1300_v54  ;;  %v1328_v15 = vmul.f32 %v2616_v13, %v2820_v18  ;;  %v3049_v23 = vadd.f32 %v1419_v17, %v2729_v27  ;;  %v1414_v58 = vmul.f32 0.2, %v1406_v1 }
  0xd4   :  { %v1028_v5 = vmul.f32 0.2, %v1020_v56  ;;  %v1013_v39 = vadd.f32 %v2829_v40, %v1000_v41  ;;  %v3034_v20 = vadd.f32 %v1034_v33, %v2729_v27 }
  0xd5   :  { %v1336_v45 = vadd.f32 %v1328_v15, %v1318_v3  ;;  %v1443_v60 = vsel %vm283_vm11, %v3049_v23, -inf  ;;  %v1422_v11 = vmax.f32 %v1406_v1, %v1414_v58 }
  0xd6   :  { %v1021_v37 = vadd.f32 %v1013_v39, %v952_v36  ;;  %1062 = vmax.xlane.f32.xlu1 %v1061_v4  ;;  %v1058_v35 = vsel %vm283_vm11, %v3034_v20, -inf  ;;  %v1036_v25 = vmax.f32 %v1020_v56, %v1028_v5 }
  0xd7   :  { %1059 = vmax.xlane.f32.xlu0 %v1058_v35  ;;  %v3578_v35 = vld [vmem:[#allocation22_spill] sm:$0xff] }
  0xd8   :  { %v1029_v40 = vmul.f32 0.2, %v1021_v37  ;;  %v1375_v61 = vpop.permute.xlu1 %1374  ;;  %v3043_v50 = vadd.f32 %v1036_v25, %v2797_v6 }
  0xd9   :  { %v1396_v16 = vadd.f32 %v2888_v30, %v1375_v61  ;;  %v3580_v61 = vld [vmem:[#allocation24_spill] sm:$0xff] }
  0xda   :  { %v1064_v8 = vsel %vm283_vm11, %v3043_v50, -inf  ;;  %v1037_v46 = vmax.f32 %v1021_v37, %v1029_v40 }
  0xdb   :  { %v1404_v34 = vadd.f32 %v1396_v16, %v1335_v53  ;;  %1065 = vmax.xlane.f32.xlu0 %v1064_v8  ;;  %v3579_v53 = vld [vmem:[#allocation23_spill] sm:$0xff] }
  0xdc   :  { %v1380_v49 = vpop.permute.xlu1 %1379  ;;  %v3052_v13 = vadd.f32 %v1037_v46, %v2841_v2 }
  0xdd   :  { %v1412_v18 = vmul.f32 0.2, %v1404_v34  ;;  %v1397_v21 = vadd.f32 %v2888_v30, %v1380_v49  ;;  %v3065_v30 = vadd.f32 %v1422_v11, %v2841_v2  ;;  %v2105_v2 = vld [vmem:[%s3505_s1 + $0x18] sm:$0xff]  }
  0xde   :  { %v1067_v7 = vsel %vm283_vm11, %v3052_v13, -inf }
  0xdf   :  { %v1405_v27 = vadd.f32 %v1397_v21, %v1336_v45  ;;  %1444 = vmax.xlane.f32.xlu0 %v1443_v60  ;;  %1068 = vmax.xlane.f32.xlu1 %v1067_v7  ;;  %v1420_v26 = vmax.f32 %v1404_v34, %v1412_v18  ;;  %v1452_v43 = vsel %vm283_vm11, %v3065_v30, -inf  ;;  %v3582_v21 = vld [vmem:[#allocation26_spill] sm:$0xff]  ;;  %v3583_v7 = vld [vmem:[#allocation27_spill] sm:$0xff] }
  0xe1   :  { %v1413_v31 = vmul.f32 0.2, %v1405_v27  ;;  %v3060_v48 = vadd.f32 %v1420_v26, %v2750_v55  ;;  %v2103_v55 = vld [vmem:[%s3505_s1 + $0x10] sm:$0xff]  }
  0xe3   :  { %v1446_v62 = vsel %vm283_vm11, %v3060_v48, -inf  ;;  %v1421_v44 = vmax.f32 %v1405_v27, %v1413_v31 }
  0xe4   :  { %1447 = vmax.xlane.f32.xlu1 %v1446_v62 }
  0xe5   :  { %v3068_v29 = vadd.f32 %v1421_v44, %v2797_v6  ;;  %v2104_v6 = vld [vmem:[%s3505_s1 + $0x8] sm:$0xff]  }
  0xe7   :  { %v1449_v36 = vsel %vm283_vm11, %v3068_v29, -inf }
  0xe8   :  { %1450 = vmax.xlane.f32.xlu0 %v1449_v36  ;;  %1453 = vmax.xlane.f32.xlu1 %v1452_v43  ;;  %v3584_v43 = vld [vmem:[#allocation28_spill] sm:$0xff] }
  0xf9   :  { %822 = vrot.lane.b32.xlu1 %v2103_v55, %s2312_s15 }
  0xfd   :  { %820 = vrot.lane.b32.xlu1 %v2104_v6, %s2312_s15 }
  0xfe   :  { %824 = vrot.lane.b32.xlu0 %v2105_v2, %s2312_s15  ;;  %v3585_v2 = vld [vmem:[#allocation29_spill] sm:$0xff] }
 0x122   :  { %v286_v56 = vpop.xlane.xlu1 %285 }
 0x123   :  { %v308_v33 = vsub.f32 %v2707_v24, %v286_v56 }
 0x125   :  { %v316_v57 = vmul.f32 1.442695, %v308_v33 }
 0x126   :  { %v289_v12 = vpop.xlane.xlu0 %288  ;;  %v295_v41 = vpop.xlane.xlu1 %294 }
 0x127   :  { %2119 = vpow2.f32 %v316_v57  ;;  %v309_v52 = vsub.f32 %v2721_v47, %v289_v12  ;;  %v311_v54 = vsub.f32 %v2724_v63, %v295_v41 }
 0x129   :  { %v318_v38 = vmul.f32 1.442695, %v309_v52  ;;  %v322_v5 = vmul.f32 1.442695, %v311_v54 }
 0x12a   :  { %v292_v39 = vpop.xlane.xlu0 %291 }
 0x12b   :  { %2121 = vpow2.f32 %v318_v38  ;;  %v310_v4 = vsub.f32 %v2743_v22, %v292_v39  ;;  %v666_v37 = vpop.xlane.xlu1 %665  ;;  %v3581_v22 = vld [vmem:[#allocation25_spill] sm:$0xff] }
 0x12c   :  { %v686_v25 = vsub.f32 %v3578_v35, %v666_v37  ;;  %2123 = vpow2.f32 %v322_v5 }
 0x12d   :  { %v320_v17 = vmul.f32 1.442695, %v310_v4 }
 0x12e   :  { %v695_v24 = vmul.f32 1.442695, %v686_v25 }
 0x12f   :  { %2125 = vpow2.f32 %v320_v17  ;;  %v663_v1 = vpop.xlane.xlu0 %662 }
 0x130   :  { %v685_v3 = vsub.f32 %v3579_v53, %v663_v1  ;;  %2127 = vpow2.f32 %v695_v24 }
 0x132   :  { %v693_v47 = vmul.f32 1.442695, %v685_v3 }
 0x133   :  { %v669_v15 = vpop.xlane.xlu0 %668  ;;  %v672_v63 = vpop.xlane.xlu1 %671 }
 0x134   :  { %v3092_v40 = vpop.eup %2119  ;;  %2129 = vpow2.f32 %v693_v47  ;;  %v687_v16 = vsub.f32 %v3580_v61, %v669_v15  ;;  %v688_v8 = vsub.f32 %v3581_v22, %v672_v63 }
 0x135   :  { %v332_v46 = vsel %vm283_vm11, %v3092_v40, 0.0 }
 0x136   :  { %v697_v58 = vmul.f32 1.442695, %v687_v16  ;;  %v699_v34 = vmul.f32 1.442695, %v688_v8  ;;  %333 = vadd.xlane.f32.xlu0 %v332_v46  ;;  %v2115_v8 = vld [vmem:[%s3505_s1 + $0x18] sm:$0xff]  }
 0x137   :  { %v298_v45 = vpop.xlane.xlu0 %297  ;;  %v301_v49 = vpop.xlane.xlu1 %300  ;;  %2008 = vmatprep.subr.bf16.mxu0 %v2115_v8 }
 0x138   :  { %v3098_v18 = vpop.eup %2121  ;;  %2131 = vpow2.f32 %v697_v58  ;;  %v312_v60 = vsub.f32 %v3582_v21, %v298_v45  ;;  %v313_v27 = vsub.f32 %v3583_v7, %v301_v49  ;;  %2009 = vmatpush3.bf16.msra.mxu0 %v2115_v8 }
 0x139   :  { %2133 = vpow2.f32 %v699_v34  ;;  %v335_v26 = vsel %vm283_vm11, %v3098_v18, 0.0  ;;  %v3104_v11 = vpop.eup %2123 }
 0x13a   :  { %v324_v31 = vmul.f32 1.442695, %v312_v60  ;;  %v326_v62 = vmul.f32 1.442695, %v313_v27  ;;  %336 = vadd.xlane.f32.xlu1 %v335_v26  ;;  %v341_v57 = vsel %vm283_vm11, %v3104_v11, 0.0  ;;  %v3586_v26 = vld [vmem:[#allocation11_spill] sm:$0xff] }
 0x13b   :  { %v304_v44 = vpop.xlane.xlu0 %303 }
 0x13c   :  { %v3106_v36 = vpop.eup %2125  ;;  %2135 = vpow2.f32 %v324_v31  ;;  %v314_v55 = vsub.f32 %v3584_v43, %v304_v44  ;;  %v307_v6 = vpop.xlane.xlu1 %306 }
 0x13d   :  { %2137 = vpow2.f32 %v326_v62  ;;  %v315_v56 = vsub.f32 %v3585_v2, %v307_v6  ;;  %v338_v33 = vsel %vm283_vm11, %v3106_v36, 0.0  ;;  %v3114_v12 = vpop.eup %2127 }
 0x13e   :  { %v328_v41 = vmul.f32 1.442695, %v314_v55  ;;  %339 = vadd.xlane.f32.xlu0 %v338_v33  ;;  %342 = vadd.xlane.f32.xlu1 %v341_v57  ;;  %v712_v4 = vsel %vm283_vm11, %v3114_v12, 0.0  ;;  %v2117_v55 = vld [vmem:[%s3505_s1 + $0x8] sm:$0xff]   ;;  %v3587_v57 = vld [vmem:[#allocation15_spill] sm:$0xff] }
 0x13f   :  { %v330_v52 = vmul.f32 1.442695, %v315_v56  ;;  %v675_v54 = vpop.xlane.xlu0 %674 }
 0x140   :  { %2139 = vpow2.f32 %v328_v41  ;;  %v689_v38 = vsub.f32 %v2876_v19, %v675_v54  ;;  %v3588_v54 = vld [vmem:[#allocation14_spill] sm:$0xff] }
 0x141   :  { %v3117_v5 = vpop.eup %2129  ;;  %2141 = vpow2.f32 %v330_v52  ;;  %v678_v39 = vpop.xlane.xlu1 %677 }
 0x142   :  { %v701_v37 = vmul.f32 1.442695, %v689_v38  ;;  %v690_v35 = vsub.f32 %v2905_v59, %v678_v39  ;;  %713 = vadd.xlane.f32.xlu1 %v712_v4  ;;  %v709_v25 = vsel %vm283_vm11, %v3117_v5, 0.0  ;;  %v2118_v4 = vld [vmem:[%s3505_s1] sm:$0xff]  }
 0x143   :  { %710 = vadd.xlane.f32.xlu0 %v709_v25 }
 0x144   :  { %2143 = vpow2.f32 %v701_v37  ;;  %v703_v17 = vmul.f32 1.442695, %v690_v35 }
 0x145   :  { %v3124_v24 = vpop.eup %2131  ;;  %v681_v19 = vpop.xlane.xlu0 %680 }
 0x146   :  { %v684_v1 = vpop.xlane.xlu1 %683  ;;  %v3126_v53 = vpop.eup %2133  ;;  %2145 = vpow2.f32 %v703_v17  ;;  %v691_v3 = vsub.f32 %v2920_v9, %v681_v19  ;;  %v715_v59 = vsel %vm283_vm11, %v3124_v24, 0.0 }
 0x147   :  { %v692_v47 = vsub.f32 %v2913_v0, %v684_v1  ;;  %716 = vadd.xlane.f32.xlu0 %v715_v59  ;;  %v718_v15 = vsel %vm283_vm11, %v3126_v53, 0.0 }
 0x148   :  { %v705_v63 = vmul.f32 1.442695, %v691_v3  ;;  %719 = vadd.xlane.f32.xlu1 %v718_v15 }
 0x149   :  { %v707_v61 = vmul.f32 1.442695, %v692_v47  ;;  %v3134_v16 = vpop.eup %2135 }
 0x14a   :  { %v1051_v22 = vpop.xlane.xlu1 %1050  ;;  %v3139_v9 = vpop.eup %2137  ;;  %2147 = vpow2.f32 %v705_v63  ;;  %v344_v58 = vsel %vm283_vm11, %v3134_v16, 0.0 }
 0x14b   :  { %v1071_v0 = vsub.f32 %v2923_v51, %v1051_v22  ;;  %v1048_v46 = vpop.xlane.xlu0 %1047  ;;  %2149 = vpow2.f32 %v707_v61  ;;  %345 = vadd.xlane.f32.xlu0 %v344_v58  ;;  %v347_v45 = vsel %vm283_vm11, %v3139_v9, 0.0  ;;  %v2116_v51 = vld [vmem:[%s3505_s1 + $0x10] sm:$0xff]  }
 0x14c   :  { %v1070_v34 = vsub.f32 %v2945_v10, %v1048_v46  ;;  %348 = vadd.xlane.f32.xlu1 %v347_v45  ;;  %2010 = vmatprep.subr.bf16.mxu0 %v2116_v51 }
 0x14d   :  { %v3147_v49 = vpop.eup %2139  ;;  %v1080_v21 = vmul.f32 1.442695, %v1071_v0  ;;  %2011 = vmatpush3.bf16.msra.mxu0 %v2116_v51 }
 0x14e   :  { %v1078_v60 = vmul.f32 1.442695, %v1070_v34  ;;  %v3152_v7 = vpop.eup %2141  ;;  %v350_v10 = vsel %vm283_vm11, %v3147_v49, 0.0  ;;  %2012 = vmatprep.subr.bf16.mxu0 %v2117_v55 }
 0x14f   :  { %v1054_v27 = vpop.xlane.xlu0 %1053  ;;  %351 = vadd.xlane.f32.xlu0 %v350_v10  ;;  %v353_v62 = vsel %vm283_vm11, %v3152_v7, 0.0 }
 0x150   :  { %2151 = vpow2.f32 %v1078_v60  ;;  %v1072_v31 = vsub.f32 %v3586_v26, %v1054_v27  ;;  %354 = vadd.xlane.f32.xlu1 %v353_v62 }
 0x151   :  { %v3159_v44 = vpop.eup %2143  ;;  %2153 = vpow2.f32 %v1080_v21  ;;  %2013 = vmatpush3.bf16.msra.mxu0 %v2117_v55 }
 0x152   :  { %v1082_v43 = vmul.f32 1.442695, %v1072_v31  ;;  %v1057_v2 = vpop.xlane.xlu1 %1056  ;;  %v721_v56 = vsel %vm283_vm11, %v3159_v44, 0.0  ;;  %2014 = vmatprep.subr.bf16.mxu0 %v2118_v4 }
 0x153   :  { %v1433_v6 = vpop.xlane.xlu0 %1432  ;;  %v3166_v33 = vpop.eup %2145  ;;  %v1073_v41 = vsub.f32 %v3587_v57, %v1057_v2  ;;  %722 = vadd.xlane.f32.xlu0 %v721_v56 }
 0x154   :  { %v724_v52 = vsel %vm283_vm11, %v3166_v33, 0.0  ;;  %2155 = vpow2.f32 %v1082_v43  ;;  %v1455_v38 = vsub.f32 %v3588_v54, %v1433_v6 }
 0x155   :  { %v1084_v39 = vmul.f32 1.442695, %v1073_v41  ;;  %725 = vadd.xlane.f32.xlu1 %v724_v52  ;;  %2015 = vmatpush3.bf16.msra.mxu0 %v2118_v4 }
 0x156   :  { %v1463_v19 = vmul.f32 1.442695, %v1455_v38 }
 0x157   :  { %v3175_v37 = vpop.eup %2147  ;;  %v1436_v35 = vpop.xlane.xlu1 %1435  ;;  %2157 = vpow2.f32 %v1084_v39 }
 0x158   :  { %v3177_v25 = vpop.eup %2149  ;;  %v727_v17 = vsel %vm283_vm11, %v3175_v37, 0.0  ;;  %v1456_v1 = vsub.f32 %v3000_v32, %v1436_v35  ;;  %2159 = vpow2.f32 %v1463_v19 }
 0x159   :  { %728 = vadd.xlane.f32.xlu0 %v727_v17  ;;  %v730_v3 = vsel %vm283_vm11, %v3177_v25, 0.0 }
 0x15a   :  { %731 = vadd.xlane.f32.xlu1 %v730_v3  ;;  %v1465_v61 = vmul.f32 1.442695, %v1456_v1 }
 0x15b   :  { %v1439_v47 = vpop.xlane.xlu0 %1438  ;;  %v1442_v59 = vpop.xlane.xlu1 %1441 }
 0x15c   :  { %v1457_v63 = vsub.f32 %v3015_v28, %v1439_v47  ;;  %v1458_v22 = vsub.f32 %v3008_v14, %v1442_v59 }
 0x15d   :  { %v3184_v15 = vpop.eup %2151 }
 0x15e   :  { %v1094_v8 = vsel %vm283_vm11, %v3184_v15, 0.0  ;;  %v3190_v0 = vpop.eup %2153  ;;  %v1467_v32 = vmul.f32 1.442695, %v1457_v63  ;;  %v1469_v45 = vmul.f32 1.442695, %v1458_v22 }
 0x15f   :  { %1095 = vadd.xlane.f32.xlu1 %v1094_v8  ;;  %v1063_v46 = vpop.xlane.xlu1 %1062  ;;  %v1097_v21 = vsel %vm283_vm11, %v3190_v0, 0.0 }
 0x160   :  { %2161 = vpow2.f32 %v1467_v32  ;;  %v1075_v58 = vsub.f32 %v3023_v42, %v1063_v46  ;;  %v1060_v34 = vpop.xlane.xlu0 %1059 }
 0x161   :  { %2163 = vpow2.f32 %v1465_v61  ;;  %v1074_v28 = vsub.f32 %v3034_v20, %v1060_v34  ;;  %v3196_v14 = vpop.eup %2155 }
 0x162   :  { %v1088_v60 = vmul.f32 1.442695, %v1075_v58  ;;  %v1100_v42 = vsel %vm283_vm11, %v3196_v14, 0.0 }
 0x163   :  { %1098 = vadd.xlane.f32.xlu1 %v1097_v21  ;;  %v1086_v51 = vmul.f32 1.442695, %v1074_v28 }
 0x164   :  { %2165 = vpow2.f32 %v1088_v60  ;;  %v1066_v27 = vpop.xlane.xlu0 %1065  ;;  %v3201_v26 = vpop.eup %2157 }
 0x165   :  { %2167 = vpow2.f32 %v1469_v45  ;;  %v1076_v10 = vsub.f32 %v3043_v50, %v1066_v27  ;;  %v1103_v6 = vsel %vm283_vm11, %v3201_v26, 0.0  ;;  %v3207_v2 = vpop.eup %2159  ;;  %v2106_v27 = vld [vmem:[%s3505_s1 + $0x18] sm:$0xff]  }
 0x166   :  { %2169 = vpow2.f32 %v1086_v51  ;;  %v1479_v52 = vsel %vm283_vm11, %v3207_v2, 0.0 }
 0x167   :  { %1101 = vadd.xlane.f32.xlu1 %v1100_v42  ;;  %v1090_v20 = vmul.f32 1.442695, %v1076_v10 }
 0x168   :  { %v1445_v31 = vpop.xlane.xlu0 %1444  ;;  %v1069_v62 = vpop.xlane.xlu1 %1068 }
 0x169   :  { %2171 = vpow2.f32 %v1090_v20  ;;  %v1459_v43 = vsub.f32 %v3049_v23, %v1445_v31  ;;  %v1077_v55 = vsub.f32 %v3052_v13, %v1069_v62  ;;  %v2107_v20 = vld [vmem:[%s3505_s1 + $0x10] sm:$0xff]   ;;  %v2108_v62 = vld [vmem:[%s3505_s1 + $0x8] sm:$0xff]  }
 0x16b   :  { %1104 = vadd.xlane.f32.xlu1 %v1103_v6  ;;  %v1092_v50 = vmul.f32 1.442695, %v1077_v55  ;;  %v1471_v56 = vmul.f32 1.442695, %v1459_v43  ;;  %v2109_v43 = vld [vmem:[%s3505_s1] sm:$0xff]   ;;  %v2111_v6 = vld [vmem:[%s3505_s1 + $0x18] sm:$0xff]  }
 0x16c   :  { %v2110_v55 = vld [vmem:[%s3505_s1] sm:$0xff]  }
 0x16d   :  { %v3209_v57 = vpop.eup %2161  ;;  %v1448_v41 = vpop.xlane.xlu1 %1447  ;;  %2173 = vpow2.f32 %v1092_v50  ;;  %v2112_v50 = vld [vmem:[%s3505_s1 + $0x10] sm:$0xff]  }
 0x16e   :  { %v3213_v54 = vpop.eup %2163  ;;  %v1460_v23 = vsub.f32 %v3060_v48, %v1448_v41  ;;  %v1485_v13 = vsel %vm283_vm11, %v3209_v57, 0.0  ;;  %2175 = vpow2.f32 %v1471_v56  ;;  %v2113_v56 = vld [vmem:[%s3505_s1 + $0x8] sm:$0xff]   ;;  %v2114_v41 = vld [vmem:[%s3505_s1] sm:$0xff]   ;;  %s2315_s1 = smov 16  }
 0x16f   :  { %1480 = vadd.xlane.f32.xlu1 %v1479_v52  ;;  %1486 = vadd.xlane.f32.xlu0 %v1485_v13  ;;  %v1482_v17 = vsel %vm283_vm11, %v3213_v54, 0.0 }
 0x170   :  { %v1473_v38 = vmul.f32 1.442695, %v1460_v23 }
 0x171   :  { %v3218_v39 = vpop.eup %2165  ;;  %v1451_v4 = vpop.xlane.xlu0 %1450 }
 0x172   :  { %v1454_v35 = vpop.xlane.xlu1 %1453  ;;  %v3222_v19 = vpop.eup %2167  ;;  %v1461_v1 = vsub.f32 %v3068_v29, %v1451_v4  ;;  %v1109_v48 = vsel %vm283_vm11, %v3218_v39, 0.0  ;;  %2177 = vpow2.f32 %v1473_v38 }
 0x173   :  { %1483 = vadd.xlane.f32.xlu1 %v1482_v17  ;;  %1110 = vadd.xlane.f32.xlu0 %v1109_v48  ;;  %v1462_v47 = vsub.f32 %v3065_v30, %v1454_v35  ;;  %v3228_v59 = vpop.eup %2169  ;;  %v1488_v63 = vsel %vm283_vm11, %v3222_v19, 0.0 }
 0x174   :  { %v1475_v3 = vmul.f32 1.442695, %v1461_v1  ;;  %v1106_v30 = vsel %vm283_vm11, %v3228_v59, 0.0 }
 0x175   :  { %v825_v61 = vpop.permute.xlu0 %824  ;;  %v1477_v32 = vmul.f32 1.442695, %v1462_v47 }
 0x176   :  { %v823_v22 = vpop.permute.xlu1 %822  ;;  %v3232_v8 = vpop.eup %2171  ;;  %2024 = vmatprep.subr.bf16.mxu1 %v825_v61  ;;  %2179 = vpow2.f32 %v1475_v3 }
 0x177   :  { %1489 = vadd.xlane.f32.xlu1 %v1488_v63  ;;  %v1112_v29 = vsel %vm283_vm11, %v3232_v8, 0.0  ;;  %2025 = vmatpush3.bf16.msra.mxu1 %v825_v61  ;;  %2181 = vpow2.f32 %v1477_v32 }
 0x178   :  { %1113 = vadd.xlane.f32.xlu0 %v1112_v29  ;;  %2026 = vmatprep.subr.bf16.mxu1 %v823_v22 }
 0x17a   :  { %v821_v46 = vpop.permute.xlu1 %820  ;;  %v3238_v58 = vpop.eup %2173 }
 0x17b   :  { %1107 = vadd.xlane.f32.xlu1 %v1106_v30  ;;  %2027 = vmatpush3.bf16.msra.mxu1 %v823_v22  ;;  %v1115_v34 = vsel %vm283_vm11, %v3238_v58, 0.0  ;;  %v3242_v45 = vpop.eup %2175 }
 0x17c   :  { %2028 = vmatprep.subr.bf16.mxu1 %v821_v46  ;;  %1116 = vadd.xlane.f32.xlu0 %v1115_v34  ;;  %v1491_v28 = vsel %vm283_vm11, %v3242_v45, 0.0 }
 0x17f   :  { %2029 = vmatpush3.bf16.msra.mxu1 %v821_v46  ;;  %v3246_v21 = vpop.eup %2177 }
 0x180   :  { %1492 = vadd.xlane.f32.xlu0 %v1491_v28  ;;  %v1494_v60 = vsel %vm283_vm11, %v3246_v21, 0.0 }
 0x183   :  { %v3250_v51 = vpop.eup %2179 }
 0x184   :  { %1495 = vadd.xlane.f32.xlu0 %v1494_v60  ;;  %v1497_v10 = vsel %vm283_vm11, %v3250_v51, 0.0  ;;  %v3257_v42 = vpop.eup %2181 }
 0x185   :  { %v1500_v31 = vsel %vm283_vm11, %v3257_v42, 0.0 }
 0x188   :  { %1498 = vadd.xlane.f32.xlu0 %v1497_v10 }
 0x18c   :  { %1209 = vrot.lane.b32.xlu1 %v2106_v27, %s2313_s28  ;;  %1501 = vadd.xlane.f32.xlu0 %v1500_v31 }
 0x190   :  { %1207 = vrot.lane.b32.xlu1 %v2107_v20, %s2313_s28 }
 0x194   :  { %1205 = vrot.lane.b32.xlu1 %v2108_v62, %s2313_s28 }
 0x198   :  { %1203 = vrot.lane.b32.xlu1 %v2109_v43, %s2313_s28 }
 0x1a2   :  { %818 = vrot.lane.b32.xlu0 %v2110_v55, %s2312_s15  ;;  %s2316_s15 = smov 32  }
 0x1a6   :  { %1594 = vrot.lane.b32.xlu0 %v2111_v6, %s2314_s2 }
 0x1aa   :  { %1592 = vrot.lane.b32.xlu0 %v2112_v50, %s2314_s2 }
 0x1ae   :  { %1590 = vrot.lane.b32.xlu0 %v2113_v56, %s2314_s2 }
 0x1b2   :  { %1588 = vrot.lane.b32.xlu0 %v2114_v41, %s2314_s2 }
 0x1bf   :  { %v334_v52 = vpop.xlane.xlu0 %333 }
 0x1c0   :  { %2183 = vrcp.f32 %v334_v52 }
 0x1c3   :  { %v337_v23 = vpop.xlane.xlu1 %336 }
 0x1c4   :  { %2185 = vrcp.f32 %v337_v23 }
 0x1c7   :  { %v340_v13 = vpop.xlane.xlu0 %339  ;;  %v343_v38 = vpop.xlane.xlu1 %342 }
 0x1c8   :  { %2187 = vrcp.f32 %v340_v13 }
 0x1c9   :  { %2189 = vrcp.f32 %v343_v38 }
 0x1cb   :  { %v714_v4 = vpop.xlane.xlu1 %713 }
 0x1cc   :  { %2191 = vrcp.f32 %v714_v4  ;;  %v711_v35 = vpop.xlane.xlu0 %710 }
 0x1cd   :  { %v2184_v17 = vpop.eup %2183  ;;  %2193 = vrcp.f32 %v711_v35 }
 0x1ce   :  { %v364_v1 = vmul.f32 %v2184_v17, %v3092_v40 }
 0x1d0   :  { %v717_v48 = vpop.xlane.xlu0 %716  ;;  %v1944_v3 = vpack.c.bf16 %v364_v1, %v364_v1 }
 0x1d1   :  { %v2186_v47 = vpop.eup %2185  ;;  %2195 = vrcp.f32 %v717_v48  ;;  %v720_v63 = vpop.xlane.xlu1 %719 }
 0x1d2   :  { %2197 = vrcp.f32 %v720_v63  ;;  %v365_v61 = vmul.f32 %v2186_v47, %v3098_v18  ;;  %405 = vst.msk [vmem:[#allocation6] sm:$0xf] %vm404_vm1, %v1944_v3 }
 0x1d4   :  { %v346_v22 = vpop.xlane.xlu0 %345  ;;  %v372_v29 = vpack.c.bf16 %v365_v61, %v364_v1  ;;  %v1945_v32 = vpack.c.bf16 %v365_v61, %v365_v61 }
 0x1d5   :  { %v2188_v30 = vpop.eup %2187  ;;  %2199 = vrcp.f32 %v346_v22  ;;  %v349_v46 = vpop.xlane.xlu1 %348 }
 0x1d6   :  { %v2190_v34 = vpop.eup %2189  ;;  %2201 = vrcp.f32 %v349_v46  ;;  %406 = vst.msk [vmem:[#allocation6 + $0x4] sm:$0xf] %vm404_vm1, %v1945_v32  ;;  %2016 = vmatprep.mubr.msk.bf16.mxu0 %vm283_vm11, %v372_v29  ;;  %v366_v40 = vmul.f32 %v2188_v30, %v3106_v36 }
 0x1d7   :  { %v367_v28 = vmul.f32 %v2190_v34, %v3104_v11 }
 0x1d8   :  { %v352_v60 = vpop.xlane.xlu0 %351  ;;  %v1946_v18 = vpack.c.bf16 %v366_v40, %v366_v40 }
 0x1d9   :  { %v2192_v27 = vpop.eup %2191  ;;  %2203 = vrcp.f32 %v352_v60  ;;  %v355_v10 = vpop.xlane.xlu1 %354  ;;  %v373_v20 = vpack.c.bf16 %v367_v28, %v366_v40  ;;  %v1947_v31 = vpack.c.bf16 %v367_v28, %v367_v28 }
 0x1da   :  { %v2194_v62 = vpop.eup %2193  ;;  %2205 = vrcp.f32 %v355_v10  ;;  %407 = vst.msk [vmem:[#allocation6 + $0x8] sm:$0xf] %vm404_vm1, %v1946_v18  ;;  %v742_v43 = vmul.f32 %v2192_v27, %v3114_v12 }
 0x1db   :  { %408 = vst.msk [vmem:[#allocation6 + $0xc] sm:$0xf] %vm404_vm1, %v1947_v31  ;;  %2017 = vmatmul.mubr.msk.bf16.vlgmr.msra.gmra.mxu0 %vm283_vm11, %v373_v20  ;;  %v741_v36 = vmul.f32 %v2194_v62, %v3117_v5 }
 0x1dc   :  { %v723_v11 = vpop.xlane.xlu0 %722  ;;  %v1953_v55 = vpack.c.bf16 %v742_v43, %v742_v43 }
 0x1dd   :  { %2207 = vrcp.f32 %v723_v11  ;;  %v749_v6 = vpack.c.bf16 %v742_v43, %v741_v36  ;;  %v1952_v50 = vpack.c.bf16 %v741_v36, %v741_v36 }
 0x1de   :  { %v2196_v56 = vpop.eup %2195  ;;  %v726_v41 = vpop.xlane.xlu1 %725  ;;  %783 = vst.msk [vmem:[#allocation6 + $0x24] sm:$0xf] %vm404_vm1, %v1953_v55 }
 0x1df   :  { %v2198_v52 = vpop.eup %2197  ;;  %2209 = vrcp.f32 %v726_v41  ;;  %782 = vst.msk [vmem:[#allocation6 + $0x20] sm:$0xf] %vm404_vm1, %v1952_v50  ;;  %2032 = vmatprep.mubr.msk.bf16.mxu1 %vm283_vm11, %v749_v6  ;;  %v3302_v12 = vmul.f32 %v2196_v56, %v3124_v24 }
 0x1e0   :  { %v3305_v5 = vmul.f32 %v2198_v52, %v3126_v53 }
 0x1e1   :  { %v1954_v23 = vpack.c.bf16 %v3302_v12, %v3302_v12 }
 0x1e2   :  { %v2200_v13 = vpop.eup %2199  ;;  %v729_v38 = vpop.xlane.xlu0 %728  ;;  %v1955_v4 = vpack.c.bf16 %v3305_v5, %v3305_v5 }
 0x1e3   :  { %v2202_v35 = vpop.eup %2201  ;;  %2211 = vrcp.f32 %v729_v38  ;;  %v732_v17 = vpop.xlane.xlu1 %731  ;;  %v368_v1 = vmul.f32 %v2200_v13, %v3134_v16  ;;  %784 = vst.msk [vmem:[#allocation6 + $0x28] sm:$0xf] %vm404_vm1, %v1954_v23 }
 0x1e4   :  { %2213 = vrcp.f32 %v732_v17  ;;  %v369_v24 = vmul.f32 %v2202_v35, %v3139_v9  ;;  %785 = vst.msk [vmem:[#allocation6 + $0x2c] sm:$0xf] %vm404_vm1, %v1955_v4 }
 0x1e5   :  { %v1948_v53 = vpack.c.bf16 %v368_v1, %v368_v1 }
 0x1e6   :  { %v2204_v48 = vpop.eup %2203  ;;  %v374_v3 = vpack.c.bf16 %v369_v24, %v368_v1  ;;  %v1949_v47 = vpack.c.bf16 %v369_v24, %v369_v24 }
 0x1e7   :  { %v2206_v63 = vpop.eup %2205  ;;  %409 = vst.msk [vmem:[#allocation6 + $0x10] sm:$0xf] %vm404_vm1, %v1948_v53  ;;  %v370_v22 = vmul.f32 %v2204_v48, %v3147_v49 }
 0x1e8   :  { %v1096_v61 = vpop.xlane.xlu1 %1095  ;;  %410 = vst.msk [vmem:[#allocation6 + $0x14] sm:$0xf] %vm404_vm1, %v1949_v47  ;;  %2020 = vmatprep.mubr.msk.bf16.mxu0 %vm283_vm11, %v374_v3  ;;  %v371_v16 = vmul.f32 %v2206_v63, %v3152_v7 }
 0x1e9   :  { %2215 = vrcp.f32 %v1096_v61  ;;  %v1950_v9 = vpack.c.bf16 %v370_v22, %v370_v22 }
 0x1ea   :  { %v2208_v29 = vpop.eup %2207  ;;  %v375_v32 = vpack.c.bf16 %v371_v16, %v370_v22  ;;  %v1951_v30 = vpack.c.bf16 %v371_v16, %v371_v16 }
 0x1eb   :  { %411 = vst.msk [vmem:[#allocation6 + $0x18] sm:$0xf] %vm404_vm1, %v1950_v9  ;;  %v3322_v34 = vmul.f32 %v2208_v29, %v3159_v44 }
 0x1ec   :  { %v1099_v46 = vpop.xlane.xlu1 %1098  ;;  %v2210_v40 = vpop.eup %2209  ;;  %412 = vst.msk [vmem:[#allocation6 + $0x1c] sm:$0xf] %vm404_vm1, %v1951_v30  ;;  %2021 = vmatmul.mubr.msk.bf16.gmra.mxu0 %vm283_vm11, %v375_v32 }
 0x1ed   :  { %2217 = vrcp.f32 %v1099_v46  ;;  %v3327_v49 = vmul.f32 %v2210_v40, %v3166_v33  ;;  %v1956_v7 = vpack.c.bf16 %v3322_v34, %v3322_v34 }
 0x1ef   :  { %v1957_v60 = vpack.c.bf16 %v3327_v49, %v3327_v49  ;;  %786 = vst.msk [vmem:[#allocation6 + $0x30] sm:$0xf] %vm404_vm1, %v1956_v7 }
 0x1f0   :  { %v1102_v28 = vpop.xlane.xlu1 %1101  ;;  %v2212_v44 = vpop.eup %2211 }
 0x1f1   :  { %2219 = vrcp.f32 %v1102_v28  ;;  %v2214_v18 = vpop.eup %2213  ;;  %787 = vst.msk [vmem:[#allocation6 + $0x34] sm:$0xf] %vm404_vm1, %v1957_v60  ;;  %v3336_v27 = vmul.f32 %v2212_v44, %v3175_v37 }
 0x1f2   :  { %v3339_v33 = vmul.f32 %v2214_v18, %v3177_v25 }
 0x1f3   :  { %v1958_v20 = vpack.c.bf16 %v3336_v27, %v3336_v27 }
 0x1f4   :  { %v1105_v10 = vpop.xlane.xlu1 %1104  ;;  %v1959_v31 = vpack.c.bf16 %v3339_v33, %v3339_v33 }
 0x1f5   :  { %2221 = vrcp.f32 %v1105_v10  ;;  %788 = vst.msk [vmem:[#allocation6 + $0x38] sm:$0xf] %vm404_vm1, %v1958_v20 }
 0x1f6   :  { %v2216_v62 = vpop.eup %2215  ;;  %789 = vst.msk [vmem:[#allocation6 + $0x3c] sm:$0xf] %vm404_vm1, %v1959_v31 }
 0x1f7   :  { %v1126_v43 = vmul.f32 %v2216_v62, %v3184_v15 }
 0x1f8   :  { %v1481_v37 = vpop.xlane.xlu1 %1480  ;;  %v1487_v36 = vpop.xlane.xlu0 %1486 }
 0x1f9   :  { %2223 = vrcp.f32 %v1481_v37  ;;  %v1960_v25 = vpack.c.bf16 %v1126_v43, %v1126_v43 }
 0x1fa   :  { %v2218_v11 = vpop.eup %2217  ;;  %2225 = vrcp.f32 %v1487_v36 }
 0x1fb   :  { %v1127_v55 = vmul.f32 %v2218_v11, %v3190_v0  ;;  %1167 = vst.msk [vmem:[#allocation6 + $0x40] sm:$0xf] %vm404_vm1, %v1960_v25 }
 0x1fc   :  { %v1484_v6 = vpop.xlane.xlu1 %1483  ;;  %v1111_v50 = vpop.xlane.xlu0 %1110 }
 0x1fd   :  { %2227 = vrcp.f32 %v1484_v6  ;;  %v1134_v56 = vpack.c.bf16 %v1127_v55, %v1126_v43  ;;  %v1961_v41 = vpack.c.bf16 %v1127_v55, %v1127_v55  ;;  %v750_v55 = vpack.c.bf16 %v3305_v5, %v3302_v12 }
 0x1fe   :  { %v2220_v52 = vpop.eup %2219  ;;  %2229 = vrcp.f32 %v1111_v50 }
 0x1ff   :  { %v3351_v15 = vmul.f32 %v2220_v52, %v3196_v14  ;;  %1168 = vst.msk [vmem:[#allocation6 + $0x44] sm:$0xf] %vm404_vm1, %v1961_v41  ;;  %2048 = vmatprep.mubr.msk.bf16.mxu0 %vm283_vm11, %v1134_v56  ;;  %v751_v56 = vpack.c.bf16 %v3327_v49, %v3322_v34  ;;  %v752_v34 = vpack.c.bf16 %v3339_v33, %v3336_v27 }
 0x200   :  { %v1490_v23 = vpop.xlane.xlu1 %1489 }
 0x201   :  { %v1962_v0 = vpack.c.bf16 %v3351_v15, %v3351_v15  ;;  %2231 = vrcp.f32 %v1490_v23  ;;  %v1114_v38 = vpop.xlane.xlu0 %1113 }
 0x202   :  { %v2222_v13 = vpop.eup %2221  ;;  %2233 = vrcp.f32 %v1114_v38 }
 0x203   :  { %1169 = vst.msk [vmem:[#allocation6 + $0x48] sm:$0xf] %vm404_vm1, %v1962_v0  ;;  %v3359_v4 = vmul.f32 %v2222_v13, %v3201_v26 }
 0x204   :  { %v1108_v35 = vpop.xlane.xlu1 %1107 }
 0x205   :  { %v1963_v14 = vpack.c.bf16 %v3359_v4, %v3359_v4  ;;  %2235 = vrcp.f32 %v1108_v35  ;;  %v1117_v24 = vpop.xlane.xlu0 %1116 }
 0x206   :  { %v2224_v17 = vpop.eup %2223  ;;  %2237 = vrcp.f32 %v1117_v24 }
 0x207   :  { %v2226_v1 = vpop.eup %2225  ;;  %1170 = vst.msk [vmem:[#allocation6 + $0x4c] sm:$0xf] %vm404_vm1, %v1963_v14  ;;  %v3365_v53 = vmul.f32 %v2224_v17, %v3207_v2 }
 0x208   :  { %v3368_v48 = vmul.f32 %v2226_v1, %v3209_v57  ;;  %v1210_v26 = vpop.permute.xlu1 %1209 }
 0x209   :  { %2040 = vmatprep.subr.bf16.mxu0 %v1210_v26  ;;  %v1968_v3 = vpack.c.bf16 %v3365_v53, %v3365_v53  ;;  %v1493_v22 = vpop.xlane.xlu0 %1492 }
 0x20a   :  { %v2228_v47 = vpop.eup %2227  ;;  %v1970_v63 = vpack.c.bf16 %v3368_v48, %v3368_v48  ;;  %2041 = vmatpush3.bf16.msra.mxu0 %v1210_v26  ;;  %2239 = vrcp.f32 %v1493_v22 }
 0x20b   :  { %v2230_v61 = vpop.eup %2229  ;;  %v3375_v16 = vmul.f32 %v2228_v47, %v3213_v54  ;;  %1552 = vst.msk [vmem:[#allocation6 + $0x60] sm:$0xf] %vm404_vm1, %v1968_v3 }
 0x20c   :  { %1554 = vst.msk [vmem:[#allocation6 + $0x68] sm:$0xf] %vm404_vm1, %v1970_v63  ;;  %v1208_v2 = vpop.permute.xlu1 %1207  ;;  %v1131_v57 = vmul.f32 %v2230_v61, %v3218_v39 }
 0x20d   :  { %2042 = vmatprep.subr.bf16.mxu0 %v1208_v2  ;;  %v1969_v9 = vpack.c.bf16 %v3375_v16, %v3375_v16  ;;  %v1496_v54 = vpop.xlane.xlu0 %1495  ;;  %v1519_v0 = vpack.c.bf16 %v3375_v16, %v3365_v53 }
 0x20e   :  { %v2232_v29 = vpop.eup %2231  ;;  %2043 = vmatpush3.bf16.msra.mxu0 %v1208_v2  ;;  %v1965_v32 = vpack.c.bf16 %v1131_v57, %v1131_v57  ;;  %2241 = vrcp.f32 %v1496_v54 }
 0x20f   :  { %v3383_v30 = vmul.f32 %v2232_v29, %v3222_v19  ;;  %1553 = vst.msk [vmem:[#allocation6 + $0x64] sm:$0xf] %vm404_vm1, %v1969_v9  ;;  %v2234_v46 = vpop.eup %2233 }
 0x210   :  { %v1206_v40 = vpop.permute.xlu1 %1205  ;;  %1172 = vst.msk [vmem:[#allocation6 + $0x54] sm:$0xf] %vm404_vm1, %v1965_v32  ;;  %v1132_v7 = vmul.f32 %v2234_v46, %v3232_v8  ;;  %v1135_v8 = vpack.c.bf16 %v3359_v4, %v3351_v15 }
 0x211   :  { %v1971_v39 = vpack.c.bf16 %v3383_v30, %v3383_v30  ;;  %2044 = vmatprep.subr.bf16.mxu0 %v1206_v40  ;;  %v1499_v19 = vpop.xlane.xlu0 %1498 }
 0x212   :  { %v2236_v28 = vpop.eup %2235  ;;  %2045 = vmatpush3.bf16.msra.mxu0 %v1206_v40  ;;  %v1966_v44 = vpack.c.bf16 %v1132_v7, %v1132_v7  ;;  %2243 = vrcp.f32 %v1499_v19 }
 0x213   :  { %1555 = vst.msk [vmem:[#allocation6 + $0x6c] sm:$0xf] %vm404_vm1, %v1971_v39  ;;  %v1130_v60 = vmul.f32 %v2236_v28, %v3228_v59  ;;  %v2238_v10 = vpop.eup %2237 }
 0x214   :  { %v1204_v18 = vpop.permute.xlu1 %1203  ;;  %1173 = vst.msk [vmem:[#allocation6 + $0x58] sm:$0xf] %vm404_vm1, %v1966_v44  ;;  %v1133_v31 = vmul.f32 %v2238_v10, %v3238_v58 }
 0x215   :  { %2046 = vmatprep.subr.bf16.mxu0 %v1204_v18  ;;  %v1964_v20 = vpack.c.bf16 %v1130_v60, %v1130_v60  ;;  %v1502_v62 = vpop.xlane.xlu0 %1501  ;;  %v1136_v43 = vpack.c.bf16 %v1131_v57, %v1130_v60 }
 0x216   :  { %2047 = vmatpush3.bf16.msra.mxu0 %v1204_v18  ;;  %2245 = vrcp.f32 %v1502_v62  ;;  %v1967_v59 = vpack.c.bf16 %v1133_v31, %v1133_v31 }
 0x217   :  { %1171 = vst.msk [vmem:[#allocation6 + $0x50] sm:$0xf] %vm404_vm1, %v1964_v20  ;;  %v2240_v37 = vpop.eup %2239 }
 0x218   :  { %1174 = vst.msk [vmem:[#allocation6 + $0x5c] sm:$0xf] %vm404_vm1, %v1967_v59  ;;  %v1515_v36 = vmul.f32 %v2240_v37, %v3242_v45  ;;  %v1137_v45 = vpack.c.bf16 %v1133_v31, %v1132_v7 }
 0x219   :  { %2049 = vmatmul.mubr.msk.bf16.vlgmr.msra.gmra.mxu0 %vm283_vm11, %v1135_v8  ;;  %v819_v25 = vpop.permute.xlu0 %818 }
 0x21a   :  { %2052 = vmatprep.mubr.msk.bf16.mxu0 %vm283_vm11, %v1136_v43  ;;  %2030 = vmatprep.subr.bf16.mxu1 %v819_v25  ;;  %v1972_v58 = vpack.c.bf16 %v1515_v36, %v1515_v36 }
 0x21b   :  { %v2242_v11 = vpop.eup %2241  ;;  %2031 = vmatpush3.bf16.msra.mxu1 %v819_v25 }
 0x21c   :  { %v1516_v6 = vmul.f32 %v2242_v11, %v3246_v21  ;;  %1556 = vst.msk [vmem:[#allocation6 + $0x70] sm:$0xf] %vm404_vm1, %v1972_v58 }
 0x21d   :  { %v1595_v50 = vpop.permute.xlu0 %1594 }
 0x21e   :  { %2033 = vmatmul.mubr.msk.bf16.vlgmr.msra.gmra.mxu1 %vm283_vm11, %v750_v55  ;;  %2056 = vmatprep.subr.bf16.mxu1 %v1595_v50  ;;  %v1973_v41 = vpack.c.bf16 %v1516_v6, %v1516_v6  ;;  %v1521_v27 = vpack.c.bf16 %v1516_v6, %v1515_v36 }
 0x21f   :  { %v2244_v52 = vpop.eup %2243  ;;  %2036 = vmatprep.mubr.msk.bf16.mxu1 %vm283_vm11, %v751_v56  ;;  %2057 = vmatpush3.bf16.msra.mxu1 %v1595_v50 }
 0x220   :  { %1557 = vst.msk [vmem:[#allocation6 + $0x74] sm:$0xf] %vm404_vm1, %v1973_v41  ;;  %v1517_v21 = vmul.f32 %v2244_v52, %v3250_v51 }
 0x221   :  { %2053 = vmatmul.mubr.msk.bf16.gmra.mxu0 %vm283_vm11, %v1137_v45  ;;  %v1593_v12 = vpop.permute.xlu0 %1592 }
 0x222   :  { %2058 = vmatprep.subr.bf16.mxu1 %v1593_v12  ;;  %v1974_v5 = vpack.c.bf16 %v1517_v21, %v1517_v21 }
 0x223   :  { %v2246_v15 = vpop.eup %2245  ;;  %2059 = vmatpush3.bf16.msra.mxu1 %v1593_v12 }
 0x224   :  { %v1518_v49 = vmul.f32 %v2246_v15, %v3257_v42  ;;  %1558 = vst.msk [vmem:[#allocation6 + $0x78] sm:$0xf] %vm404_vm1, %v1974_v5  ;;  %v1520_v42 = vpack.c.bf16 %v3383_v30, %v3368_v48 }
 0x225   :  { %v1591_v23 = vpop.permute.xlu0 %1590 }
 0x226   :  { %2037 = vmatmul.mubr.msk.bf16.gmra.mxu1 %vm283_vm11, %v752_v34  ;;  %2060 = vmatprep.subr.bf16.mxu1 %v1591_v23  ;;  %v1975_v51 = vpack.c.bf16 %v1518_v49, %v1518_v49  ;;  %v1522_v33 = vpack.c.bf16 %v1518_v49, %v1517_v21 }
 0x227   :  { %2061 = vmatpush3.bf16.msra.mxu1 %v1591_v23  ;;  %2064 = vmatprep.mubr.msk.bf16.mxu1 %vm283_vm11, %v1519_v0 }
 0x228   :  { %1559 = vst.msk [vmem:[#allocation6 + $0x7c] sm:$0xf] %vm404_vm1, %v1975_v51 }
 0x229   :  { %v1589_v13 = vpop.permute.xlu0 %1588 }
 0x22a   :  { %2062 = vmatprep.subr.bf16.mxu1 %v1589_v13 }
 0x22b   :  { %2063 = vmatpush3.bf16.msra.mxu1 %v1589_v13 }
 0x22e   :  { %2065 = vmatmul.mubr.msk.bf16.vlgmr.msra.gmra.mxu1 %vm283_vm11, %v1520_v42 }
 0x22f   :  { %2068 = vmatprep.mubr.msk.bf16.mxu1 %vm283_vm11, %v1521_v27 }
 0x236   :  { %2069 = vmatmul.mubr.msk.bf16.gmra.mxu1 %vm283_vm11, %v1522_v33 }
 0x29b   :  { %v3426_v38 = vpop.f32.mrf.mxu0 }
 0x29d   :  { %v3428_v4 = vpop.f32.mrf.mxu0 }
 0x29f   :  { %v3430_v35 = vpop.f32.mrf.mxu0 }
 0x2a1   :  { %v3432_v14 = vpop.f32.mrf.mxu0 }
 0x2ac   :  { %v3434_v17 = vpop.f32.mrf.mxu0 }
 0x2ae   :  { %v3436_v24 = vpop.f32.mrf.mxu0 }
 0x2b0   :  { %v3438_v26 = vpop.f32.mrf.mxu0 }
 0x2b2   :  { %v3440_v63 = vpop.f32.mrf.mxu0 }
 0x2d9   :  { %v2050_v22 = vpop.f32.mrf.mxu0 }
 0x2db   :  { %v1261_v57 = vpop.f32.mrf.mxu0 }
 0x2dd   :  { %v2051_v29 = vpop.f32.mrf.mxu0 }
 0x2de   :  { %v2034_v1 = vpop.f32.mrf.mxu1 }
 0x2df   :  { %1689 = vrot.lane.b32.xlu1 %v2034_v1, %s2315_s1  ;;  %v1264_v30 = vpop.f32.mrf.mxu0 }
 0x2e0   :  { %v876_v53 = vpop.f32.mrf.mxu1 }
 0x2e1   :  { %v2054_v46 = vpop.f32.mrf.mxu0 }
 0x2e2   :  { %v2035_v48 = vpop.f32.mrf.mxu1 }
 0x2e3   :  { %1685 = vrot.lane.b32.xlu1 %v876_v53, %s2315_s1  ;;  %1691 = vrot.lane.b32.xlu0 %v2035_v48, %s2315_s1  ;;  %v1277_v39 = vpop.f32.mrf.mxu0 }
 0x2e4   :  { %v879_v3 = vpop.f32.mrf.mxu1 }
 0x2e5   :  { %v2055_v28 = vpop.f32.mrf.mxu0 }
 0x2e6   :  { %v2038_v47 = vpop.f32.mrf.mxu1 }
 0x2e7   :  { %1687 = vrot.lane.b32.xlu0 %v879_v3, %s2315_s1  ;;  %1697 = vrot.lane.b32.xlu1 %v2038_v47, %s2315_s1  ;;  %v1280_v60 = vpop.f32.mrf.mxu0 }
 0x2e8   :  { %v892_v61 = vpop.f32.mrf.mxu1 }
 0x2ea   :  { %v2039_v16 = vpop.f32.mrf.mxu1 }
 0x2eb   :  { %1693 = vrot.lane.b32.xlu1 %v892_v61, %s2315_s1  ;;  %1699 = vrot.lane.b32.xlu0 %v2039_v16, %s2315_s1 }
 0x2ec   :  { %v895_v2 = vpop.f32.mrf.mxu1 }
 0x2ee   :  { %v2066_v9 = vpop.f32.mrf.mxu1 }
 0x2ef   :  { %1695 = vrot.lane.b32.xlu0 %v895_v2, %s2315_s1  ;;  %1721 = vrot.lane.b32.xlu1 %v2050_v22, %s2316_s15 }
 0x2f0   :  { %v1646_v32 = vpop.f32.mrf.mxu1 }
 0x2f2   :  { %v2067_v54 = vpop.f32.mrf.mxu1 }
 0x2f3   :  { %1753 = vrot.lane.b32.xlu1 %v2066_v9, %s2317_s20  ;;  %1723 = vrot.lane.b32.xlu0 %v2051_v29, %s2316_s15 }
 0x2f4   :  { %v1649_v40 = vpop.f32.mrf.mxu1 }
 0x2f6   :  { %v2070_v7 = vpop.f32.mrf.mxu1 }
 0x2f7   :  { %1717 = vrot.lane.b32.xlu1 %v1261_v57, %s2316_s15  ;;  %1755 = vrot.lane.b32.xlu0 %v2067_v54, %s2317_s20 }
 0x2f8   :  { %v1662_v19 = vpop.f32.mrf.mxu1 }
 0x2fa   :  { %v2071_v44 = vpop.f32.mrf.mxu1 }
 0x2fb   :  { %1749 = vrot.lane.b32.xlu1 %v1646_v32, %s2317_s20  ;;  %1719 = vrot.lane.b32.xlu0 %v1264_v30, %s2316_s15 }
 0x2ff   :  { %1751 = vrot.lane.b32.xlu0 %v1649_v40, %s2317_s20  ;;  %1729 = vrot.lane.b32.xlu1 %v2054_v46, %s2316_s15 }
 0x303   :  { %1725 = vrot.lane.b32.xlu1 %v1277_v39, %s2316_s15  ;;  %1731 = vrot.lane.b32.xlu0 %v2055_v28, %s2316_s15 }
 0x304   :  { %2270 = shalt.err (!%p2267_p9)
}
 0x305   :  { %s2319_s23 = smov 64   ;;  %s2320_s24 = smov 4   ;;  %v1665_v18 = vpop.f32.mrf.mxu1  ;;  %vm1773_vm2 = vcmask 130048   ;;  %vm1782_vm3 = vcmask 261120   ;;  %vm1791_vm4 = vcmask 392192  }
 0x306   :  { %1831 = dma.vmem_to_hbm [thread:$0]  %s1826_s22, 2048, %s3510_s6, [#allocation7], %s2319_s23, %s2319_s23, %s2320_s24  }
 0x307   :  { %1757 = vrot.lane.b32.xlu1 %v1662_v19, %s2317_s20  ;;  %1727 = vrot.lane.b32.xlu0 %v1280_v60, %s2316_s15  ;;  %s2321_s6 = smov [#allocation5]  }
 0x308   :  { %s1813_s27 = sshll.u32 %s2321_s6, 4  ;;  %s1814_s27 = int_to_ptr.vmem [resolvable:$true] %s1813_s27 }
 0x309   :  { %s2279_s28 = scalar_lea.vmem %s1814_s27, 1024  ;;  %p2284_p11 = scmp.lt.s32.totalorder %s1814_s27, %s1814_s27 }
 0x30a   :  { %p2280_p10 = scmp.ne.s32.totalorder %s1814_s27, %s2279_s28  ;;  %p2285_p12 = scmp.lt.s32.totalorder %s2279_s28, %s2279_s28 }
 0x30b   :  { %1761 = vrot.lane.b32.xlu1 %v2070_v7, %s2317_s20  ;;  %1759 = vrot.lane.b32.xlu0 %v1665_v18, %s2317_s20 }
 0x30c   :  { %p2286_p13 = por %p2285_p12, %p2284_p11 }
 0x30e   :  { %p2287_p0 = pnand %p2286_p13, %p2280_p10 }
 0x30f   :  { %1763 = vrot.lane.b32.xlu0 %v2071_v44, %s2317_s20 }
 0x351   :  { %v1690_v10 = vpop.permute.xlu1 %1689 }
 0x352   :  { %v1776_v25 = vsel %vm1773_vm2, %v3426_v38, %v1690_v10 }
 0x355   :  { %v1692_v20 = vpop.permute.xlu0 %1691  ;;  %v1686_v31 = vpop.permute.xlu1 %1685 }
 0x356   :  { %v1777_v50 = vsel %vm1773_vm2, %v3430_v35, %v1692_v20  ;;  %v1774_v21 = vsel %vm1773_vm2, %v3428_v4, %v1686_v31 }
 0x359   :  { %v1688_v8 = vpop.permute.xlu0 %1687  ;;  %v1698_v62 = vpop.permute.xlu1 %1697 }
 0x35a   :  { %v1775_v49 = vsel %vm1773_vm2, %v3432_v14, %v1688_v8  ;;  %v1780_v14 = vsel %vm1773_vm2, %v3434_v17, %v1698_v62 }
 0x35d   :  { %v1700_v43 = vpop.permute.xlu0 %1699  ;;  %v1694_v59 = vpop.permute.xlu1 %1693 }
 0x35e   :  { %v1778_v33 = vsel %vm1773_vm2, %v3436_v24, %v1694_v59  ;;  %v1781_v17 = vsel %vm1773_vm2, %v3438_v26, %v1700_v43 }
 0x361   :  { %v1696_v37 = vpop.permute.xlu0 %1695  ;;  %v1722_v36 = vpop.permute.xlu1 %1721 }
 0x362   :  { %v1785_v58 = vsel %vm1782_vm3, %v1776_v25, %v1722_v36  ;;  %v1779_v53 = vsel %vm1773_vm2, %v3440_v63, %v1696_v37 }
 0x365   :  { %v1724_v11 = vpop.permute.xlu0 %1723  ;;  %v1754_v55 = vpop.permute.xlu1 %1753 }
 0x366   :  { %v1794_v6 = vsel %vm1791_vm4, %v1785_v58, %v1754_v55  ;;  %v1786_v56 = vsel %vm1782_vm3, %v1777_v50, %v1724_v11 }
 0x367   :  { %1802 = vst.msk [vmem:[#allocation5 + $0x10] sm:$0xff] %vm283_vm11, %v1794_v6 }
 0x369   :  { %v1756_v45 = vpop.permute.xlu0 %1755  ;;  %v1718_v41 = vpop.permute.xlu1 %1717 }
 0x36a   :  { %v1795_v52 = vsel %vm1791_vm4, %v1786_v56, %v1756_v45  ;;  %v1783_v12 = vsel %vm1782_vm3, %v1774_v21, %v1718_v41 }
 0x36b   :  { %1803 = vst.msk [vmem:[#allocation5 + $0x18] sm:$0xff] %vm283_vm11, %v1795_v52 }
 0x36d   :  { %v1720_v5 = vpop.permute.xlu0 %1719  ;;  %v1750_v15 = vpop.permute.xlu1 %1749 }
 0x36e   :  { %v1792_v34 = vsel %vm1791_vm4, %v1783_v12, %v1750_v15  ;;  %v1784_v23 = vsel %vm1782_vm3, %v1775_v49, %v1720_v5 }
 0x36f   :  { %1800 = vst.msk [vmem:[#allocation5] sm:$0xff] %vm283_vm11, %v1792_v34 }
 0x371   :  { %v1752_v0 = vpop.permute.xlu0 %1751  ;;  %v1730_v51 = vpop.permute.xlu1 %1729 }
 0x372   :  { %v1793_v13 = vsel %vm1791_vm4, %v1784_v23, %v1752_v0  ;;  %v1789_v48 = vsel %vm1782_vm3, %v1780_v14, %v1730_v51 }
 0x373   :  { %1801 = vst.msk [vmem:[#allocation5 + $0x8] sm:$0xff] %vm283_vm11, %v1793_v13 }
 0x375   :  { %v1732_v42 = vpop.permute.xlu0 %1731  ;;  %v1726_v27 = vpop.permute.xlu1 %1725 }
 0x376   :  { %v1787_v38 = vsel %vm1782_vm3, %v1778_v33, %v1726_v27  ;;  %v1790_v63 = vsel %vm1782_vm3, %v1781_v17, %v1732_v42 }
 0x379   :  { %v1728_v4 = vpop.permute.xlu0 %1727  ;;  %v1758_v35 = vpop.permute.xlu1 %1757 }
 0x37a   :  { %v1796_v1 = vsel %vm1791_vm4, %v1787_v38, %v1758_v35  ;;  %v1788_v3 = vsel %vm1782_vm3, %v1779_v53, %v1728_v4 }
 0x37b   :  { %1804 = vst.msk [vmem:[#allocation5 + $0x20] sm:$0xff] %vm283_vm11, %v1796_v1 }
 0x37d   :  { %v1760_v47 = vpop.permute.xlu0 %1759  ;;  %v1762_v24 = vpop.permute.xlu1 %1761 }
 0x37e   :  { %v1797_v61 = vsel %vm1791_vm4, %v1788_v3, %v1760_v47  ;;  %v1798_v22 = vsel %vm1791_vm4, %v1789_v48, %v1762_v24 }
 0x37f   :  { %1805 = vst.msk [vmem:[#allocation5 + $0x28] sm:$0xff] %vm283_vm11, %v1797_v61  ;;  %1806 = vst.msk [vmem:[#allocation5 + $0x30] sm:$0xff] %vm283_vm11, %v1798_v22 }
 0x381   :  { %v1764_v16 = vpop.permute.xlu0 %1763 }
 0x382   :  { %v1799_v2 = vsel %vm1791_vm4, %v1790_v63, %v1764_v16 }
 0x383   :  { %1807 = vst.msk [vmem:[#allocation5 + $0x38] sm:$0xff] %vm283_vm11, %v1799_v2 }
 0x384   :  { %2290 = shalt.err (!%p2287_p0)
}
 0x385   :  { %s2322_s29 = smov 128   ;;  %s2323_s0 = smov 8  }
 0x386   :  { %1819 = dma.vmem_to_hbm [thread:$0]  %s1814_s27, 1024, %s3509_s5, [#allocation3], %s2322_s29, %s2322_s29, %s2323_s0  }
 0x387   :  { %2301 = dma.done.wait [#allocation3], 1024  }
 0x388   :  { %2302 = vsyncadd [#allocation3], 4294966272 }
 0x389   :  { %2303 = dma.done.wait [#allocation7], 2048  }
 0x38a   :  { %2304 = vsyncadd [#allocation7], 4294965248 }
 0x38b   :  { %1838 = vsyncpa [#allocation3], 1 }
 0x38c   :  { %1839 = vsyncpa [#allocation7], 1 }
 0x38d   :  { %1840 = vsyncpa [#allocation4], 1 }

</bundles_post_ra>
